<compile_context>
chip_gen: v7x
topology: tpu7x:2x2x1
jax: 0.10.0
libtpu: 0.0.40
codegen_flags: <defaults>
</compile_context>

<pallas_src>
import functools
from math import sqrt

import jax
import jax.numpy as jnp
from jax.experimental import pallas as pl
from jax.experimental.pallas import tpu as pltpu


# ----------------------------- Pallas kernel ------------------------------- #

def mhsa_fused_kernel(x_ref, w_ref, o_ref, *, num_heads, dim_k, tiles, seq,
                      scale):
    """Fused QKV projection + multi-head attention for T (b, n) tiles.

    x_ref : (T*K, dim_in)       T tiles' rows, flattened (wrapper-side reshape)
    w_ref : (dim_in, 3*dim_k)   fused [Wq; Wk; Wv], pre-transposed in wrapper,
                                resident in VMEM across grid steps
    o_ref : (T, K, dim_v)       per-step output slab, heads folded lane-dense
    """
    T, S = tiles, seq
    nh = num_heads
    dk = dim_k // nh

    x = x_ref[...]                      # (T*K, dim_in)
    w = w_ref[...]                      # (dim_in, 3*dim_k)

    # One fused MXU matmul for ALL tiles in this step (amortizes the MXU
    # fill/drain over T*K LHS rows instead of K rows per step).
    qkv = jnp.dot(x, w, preferred_element_type=jnp.float32)   # (T*K, 3*dim_k)

    # (T*K, .) -> (T, K, .): split of the leading sublane groups only
    # (K == 8 keeps every (8, 128) f32 tile intact; no cross-lane movement).
    qkv3 = qkv.reshape(T, S, 3 * dim_k)
    q = qkv3[:, :, 0 * dim_k:1 * dim_k] * scale   # fold 1/sqrt(dk) into q once
    k = qkv3[:, :, 1 * dim_k:2 * dim_k]
    v = qkv3[:, :, 2 * dim_k:3 * dim_k]

    # Move the head axis into the (cheap) leading batch dim: the per-head lane
    # slices below are the same slices the per-head loop would do anyway, but
    # afterwards the softmax + both attention matmuls each run ONCE on
    # (nh*T, K, .) slabs instead of nh times on tiny fragments.
    qb = jnp.concatenate([q[:, :, h * dk:(h + 1) * dk] for h in range(nh)],
                         axis=0)                              # (nh*T, K, dk)
    kb = jnp.concatenate([k[:, :, h * dk:(h + 1) * dk] for h in range(nh)],
                         axis=0)                              # (nh*T, K, dk)
    vb = jnp.concatenate([v[:, :, h * dk:(h + 1) * dk] for h in range(nh)],
                         axis=0)                              # (nh*T, K, dk)

    # Batched scaled-dot-product attention over the (head, tile) batch dim.
    s = jnp.einsum('tqd,tkd->tqk', qb, kb,
                   preferred_element_type=jnp.float32)        # (nh*T, K, K)
    m = jnp.max(s, axis=-1, keepdims=True)
    e = jnp.exp(s - m)
    denom = jnp.sum(e, axis=-1, keepdims=True)
    # One reciprocal per row instead of K divides per row.
    # (pl.reciprocal(denom, approx=True) would move it to the EUP on v6e/v7x,
    #  but needs ~1e-3 tolerance; kept exact to hold 1e-4.)
    p = e * pl.reciprocal(denom)
    ob = jnp.einsum('tqk,tkd->tqd', p, vb,
                    preferred_element_type=jnp.float32)       # (nh*T, K, dk)

    # Back to (T, K, nh*dk) = (T, K, dim_v), heads lane-dense in PyTorch's
    # pre-merge order; one contiguous slab store per step. The module's quirky
    # (n, h) merge shuffle is done in the wrapper.
    o_ref[...] = jnp.concatenate(
        [ob[h * T:(h + 1) * T] for h in range(nh)], axis=-1)


# ------------------------------- Wrapper ----------------------------------- #

def multi_head_self_attention(x, wq, wk, wv, num_heads):
    """Pallas implementation of MultiHeadSelfAttention.forward.

    x  : (B, N, K, dim_in) float32
    wq : (dim_k, dim_in)   (PyTorch nn.Linear weight layout, no bias)
    wk : (dim_k, dim_in)
    wv : (dim_v, dim_in)   (module requires dim_v == dim_k in practice)
    """
    B, N, K, dim_in = x.shape
    dim_k = wq.shape[0]
    dim_v = wv.shape[0]
    nh = num_heads
    dk = dim_k // nh
    assert dim_k % nh == 0 and dim_v % nh == 0
    assert dim_v == dim_k  # required by the reference module's own reshapes
    scale = 1.0 / sqrt(dk)

    BN = B * N
    # Grid collapse: the whole problem fits in VMEM in one step, so the old
    # 8-step grid was pure per-step overhead. Keep 2 parallel steps (when BN is
    # even) so v7x's second TensorCore isn't idle; on v5e/v6e the extra step
    # costs ~0.35 us — negligible vs. the 8-step baseline.
    num_steps = 2 if (BN % 2 == 0 and BN >= 2) else 1
    T = BN // num_steps

    # Fused weight, pre-transposed ONCE in the wrapper to (dim_in, 3*dim_k):
    # one tiny XLA op amortized across all steps, standard dim-0 contraction
    # in the kernel (no per-step relayout risk).
    w_all = jnp.concatenate([wq, wk, wv], axis=0).T           # (dim_in, 3*dim_k)

    # Row-major flatten (metadata-only): rows are (b*N + n)*K + k.
    x_2d = x.reshape(BN * K, dim_in)

    out_bn = pl.pallas_call(
        functools.partial(mhsa_fused_kernel, num_heads=nh, dim_k=dim_k,
                          tiles=T, seq=K, scale=scale),
        out_shape=jax.ShapeDtypeStruct((BN, K, dim_v), jnp.float32),
        grid=(num_steps,),
        in_specs=[
            pl.BlockSpec((T * K, dim_in), lambda i: (i, 0)),        # T tiles/step
            pl.BlockSpec((dim_in, 3 * dim_k), lambda i: (0, 0)),    # resident W
        ],
        out_specs=pl.BlockSpec((T, K, dim_v), lambda i: (i, 0, 0)),
        compiler_params=pltpu.CompilerParams(
            dimension_semantics=("parallel",)),
    )(x_2d, w_all)

    # PyTorch-quirk head merge, exactly like the module:
    # (B,N,K,nh,dk) --permute--> (B,nh,N,K,dk) --reshape--> (B,N,K,dim_v)
    # Negligible at these sizes; fold into out_specs only if shapes scale.
    att5 = out_bn.reshape(B, N, K, nh, dk)
    out = att5.transpose(0, 3, 1, 2, 4).reshape(B, N, K, dim_v)
    return out


# --------------------------- Pure-JAX reference ----------------------------- #

def reference(x, wq, wk, wv, num_heads):
    B, N, K, dim_in = x.shape
    dim_k = wq.shape[0]
    dim_v = wv.shape[0]
    nh = num_heads
    dk = dim_k // nh
    q = (x @ wq.T).reshape(B, N, K, nh, dk).transpose(0, 1, 3, 2, 4)
    k = (x @ wk.T).reshape(B, N, K, nh, dk).transpose(0, 1, 3, 2, 4)
    v = (x @ wv.T).reshape(B, N, K, nh, dk).transpose(0, 1, 3, 2, 4)
    dist = jnp.einsum('bnhqd,bnhkd->bnhqk', q, k) / sqrt(dk)
    dist = jax.nn.softmax(dist, axis=-1)
    att = jnp.einsum('bnhqk,bnhkd->bnhqd', dist, v)
    return att.transpose(0, 2, 1, 3, 4).reshape(B, N, K, dim_v)


# ---------------------------------- Main ------------------------------------ #

if __name__ == "__main__":
    # Small shapes consistent with the module's forward.
    B, N, K = 2, 4, 8
    dim_in, dim_k, dim_v, num_heads = 16, 32, 32, 8

    key = jax.random.PRNGKey(0)
    kx, kq, kk, kv = jax.random.split(key, 4)

    # Deterministic parameter init (nn.Linear-style uniform bound, no bias).
    bound = 1.0 / sqrt(dim_in)
    wq = jax.random.uniform(kq, (dim_k, dim_in), jnp.float32, -bound, bound)
    wk = jax.random.uniform(kk, (dim_k, dim_in), jnp.float32, -bound, bound)
    wv = jax.random.uniform(kv, (dim_v, dim_in), jnp.float32, -bound, bound)

    x = jax.random.normal(kx, (B, N, K, dim_in), jnp.float32)

    out = multi_head_self_attention(x, wq, wk, wv, num_heads)
    out = jax.block_until_ready(out)

    ref = reference(x, wq, wk, wv, num_heads)
    assert out.shape == (B, N, K, dim_v), out.shape
    assert jnp.allclose(out, ref, atol=1e-4, rtol=1e-4), "mismatch vs reference"

    print("KERNEL_OK")
</pallas_src>

<mosaic_0001>
module attributes {stable_mosaic.version = 11 : i64} {
  func.func @mhsa_fused_kernel(%arg0: i32, %arg1: memref<32x16xf32, #tpu.memory_space<vmem>>, %arg2: memref<16x96xf32, #tpu.memory_space<vmem>>, %arg3: memref<4x8x32xf32, #tpu.memory_space<vmem>>) attributes {dimension_semantics = [#tpu.dimension_semantics<parallel>], iteration_bounds = array<i64: 2>, scalar_prefetch = 0 : i64, scratch_operands = 0 : i64, tpu.core_type = #tpu.core_type<tc>, window_params = [{transform_indices = @transform_0, window_bounds = array<i64: 32, 16>}, {pipeline_mode = #tpu.pipeline_mode<synchronous>, transform_indices = @transform_1, window_bounds = array<i64: 16, 96>}, {transform_indices = @transform_2, window_bounds = array<i64: 4, 8, 32>}]} {
    %c0 = arith.constant 0 : index
    %c0_0 = arith.constant 0 : index
    %0 = vector.load %arg1[%c0, %c0_0] : memref<32x16xf32, #tpu.memory_space<vmem>>, vector<32x16xf32>
    %c0_1 = arith.constant 0 : index
    %c0_2 = arith.constant 0 : index
    %1 = vector.load %arg2[%c0_1, %c0_2] : memref<16x96xf32, #tpu.memory_space<vmem>>, vector<16x96xf32>
    %cst = arith.constant dense<0.000000e+00> : vector<32x96xf32>
    %2 = tpu.matmul %0, %1, %cst {dimension_numbers = #tpu.dot_dimension_numbers<[1], [0], [0], [1], [0, 0, 1, 1], [], []>} : vector<32x16xf32>, vector<16x96xf32>, vector<32x96xf32> -> vector<32x96xf32>
    %3 = vector.shape_cast %2 : vector<32x96xf32> to vector<4x8x96xf32>
    %4 = vector.extract_strided_slice %3 {offsets = [0, 0, 0], sizes = [4, 8, 32], strides = [1, 1, 1]} : vector<4x8x96xf32> to vector<4x8x32xf32>
    %cst_3 = arith.constant 5.000000e-01 : f32
    %5 = vector.broadcast %cst_3 : f32 to vector<4x8x32xf32>
    %6 = arith.mulf %4, %5 : vector<4x8x32xf32>
    %7 = vector.extract_strided_slice %3 {offsets = [0, 0, 32], sizes = [4, 8, 32], strides = [1, 1, 1]} : vector<4x8x96xf32> to vector<4x8x32xf32>
    %8 = vector.extract_strided_slice %3 {offsets = [0, 0, 64], sizes = [4, 8, 32], strides = [1, 1, 1]} : vector<4x8x96xf32> to vector<4x8x32xf32>
    %9 = vector.extract_strided_slice %6 {offsets = [0, 0, 0], sizes = [4, 8, 4], strides = [1, 1, 1]} : vector<4x8x32xf32> to vector<4x8x4xf32>
    %10 = vector.extract_strided_slice %6 {offsets = [0, 0, 4], sizes = [4, 8, 4], strides = [1, 1, 1]} : vector<4x8x32xf32> to vector<4x8x4xf32>
    %11 = vector.extract_strided_slice %6 {offsets = [0, 0, 8], sizes = [4, 8, 4], strides = [1, 1, 1]} : vector<4x8x32xf32> to vector<4x8x4xf32>
    %12 = vector.extract_strided_slice %6 {offsets = [0, 0, 12], sizes = [4, 8, 4], strides = [1, 1, 1]} : vector<4x8x32xf32> to vector<4x8x4xf32>
    %13 = vector.extract_strided_slice %6 {offsets = [0, 0, 16], sizes = [4, 8, 4], strides = [1, 1, 1]} : vector<4x8x32xf32> to vector<4x8x4xf32>
    %14 = vector.extract_strided_slice %6 {offsets = [0, 0, 20], sizes = [4, 8, 4], strides = [1, 1, 1]} : vector<4x8x32xf32> to vector<4x8x4xf32>
    %15 = vector.extract_strided_slice %6 {offsets = [0, 0, 24], sizes = [4, 8, 4], strides = [1, 1, 1]} : vector<4x8x32xf32> to vector<4x8x4xf32>
    %16 = vector.extract_strided_slice %6 {offsets = [0, 0, 28], sizes = [4, 8, 4], strides = [1, 1, 1]} : vector<4x8x32xf32> to vector<4x8x4xf32>
    %17 = tpu.concatenate %9, %10, %11, %12, %13, %14, %15, %16 in 0 : vector<4x8x4xf32>, vector<4x8x4xf32>, vector<4x8x4xf32>, vector<4x8x4xf32>, vector<4x8x4xf32>, vector<4x8x4xf32>, vector<4x8x4xf32>, vector<4x8x4xf32> -> vector<32x8x4xf32>
    %18 = vector.extract_strided_slice %7 {offsets = [0, 0, 0], sizes = [4, 8, 4], strides = [1, 1, 1]} : vector<4x8x32xf32> to vector<4x8x4xf32>
    %19 = vector.extract_strided_slice %7 {offsets = [0, 0, 4], sizes = [4, 8, 4], strides = [1, 1, 1]} : vector<4x8x32xf32> to vector<4x8x4xf32>
    %20 = vector.extract_strided_slice %7 {offsets = [0, 0, 8], sizes = [4, 8, 4], strides = [1, 1, 1]} : vector<4x8x32xf32> to vector<4x8x4xf32>
    %21 = vector.extract_strided_slice %7 {offsets = [0, 0, 12], sizes = [4, 8, 4], strides = [1, 1, 1]} : vector<4x8x32xf32> to vector<4x8x4xf32>
    %22 = vector.extract_strided_slice %7 {offsets = [0, 0, 16], sizes = [4, 8, 4], strides = [1, 1, 1]} : vector<4x8x32xf32> to vector<4x8x4xf32>
    %23 = vector.extract_strided_slice %7 {offsets = [0, 0, 20], sizes = [4, 8, 4], strides = [1, 1, 1]} : vector<4x8x32xf32> to vector<4x8x4xf32>
    %24 = vector.extract_strided_slice %7 {offsets = [0, 0, 24], sizes = [4, 8, 4], strides = [1, 1, 1]} : vector<4x8x32xf32> to vector<4x8x4xf32>
    %25 = vector.extract_strided_slice %7 {offsets = [0, 0, 28], sizes = [4, 8, 4], strides = [1, 1, 1]} : vector<4x8x32xf32> to vector<4x8x4xf32>
    %26 = tpu.concatenate %18, %19, %20, %21, %22, %23, %24, %25 in 0 : vector<4x8x4xf32>, vector<4x8x4xf32>, vector<4x8x4xf32>, vector<4x8x4xf32>, vector<4x8x4xf32>, vector<4x8x4xf32>, vector<4x8x4xf32>, vector<4x8x4xf32> -> vector<32x8x4xf32>
    %27 = vector.extract_strided_slice %8 {offsets = [0, 0, 0], sizes = [4, 8, 4], strides = [1, 1, 1]} : vector<4x8x32xf32> to vector<4x8x4xf32>
    %28 = vector.extract_strided_slice %8 {offsets = [0, 0, 4], sizes = [4, 8, 4], strides = [1, 1, 1]} : vector<4x8x32xf32> to vector<4x8x4xf32>
    %29 = vector.extract_strided_slice %8 {offsets = [0, 0, 8], sizes = [4, 8, 4], strides = [1, 1, 1]} : vector<4x8x32xf32> to vector<4x8x4xf32>
    %30 = vector.extract_strided_slice %8 {offsets = [0, 0, 12], sizes = [4, 8, 4], strides = [1, 1, 1]} : vector<4x8x32xf32> to vector<4x8x4xf32>
    %31 = vector.extract_strided_slice %8 {offsets = [0, 0, 16], sizes = [4, 8, 4], strides = [1, 1, 1]} : vector<4x8x32xf32> to vector<4x8x4xf32>
    %32 = vector.extract_strided_slice %8 {offsets = [0, 0, 20], sizes = [4, 8, 4], strides = [1, 1, 1]} : vector<4x8x32xf32> to vector<4x8x4xf32>
    %33 = vector.extract_strided_slice %8 {offsets = [0, 0, 24], sizes = [4, 8, 4], strides = [1, 1, 1]} : vector<4x8x32xf32> to vector<4x8x4xf32>
    %34 = vector.extract_strided_slice %8 {offsets = [0, 0, 28], sizes = [4, 8, 4], strides = [1, 1, 1]} : vector<4x8x32xf32> to vector<4x8x4xf32>
    %35 = tpu.concatenate %27, %28, %29, %30, %31, %32, %33, %34 in 0 : vector<4x8x4xf32>, vector<4x8x4xf32>, vector<4x8x4xf32>, vector<4x8x4xf32>, vector<4x8x4xf32>, vector<4x8x4xf32>, vector<4x8x4xf32>, vector<4x8x4xf32> -> vector<32x8x4xf32>
    "tpu.trace_start"() <{level = 10 : i32, message = "tqd,tkd->tqk"}> : () -> ()
    %cst_4 = arith.constant dense<0.000000e+00> : vector<32x8x8xf32>
    %36 = tpu.matmul %17, %26, %cst_4 {dimension_numbers = #tpu.dot_dimension_numbers<[2], [2], [1], [1], [0, 0, 0, 1, 1, 1], [0], [0]>} : vector<32x8x4xf32>, vector<32x8x4xf32>, vector<32x8x8xf32> -> vector<32x8x8xf32>
    "tpu.trace_stop"() : () -> ()
    %cst_5 = arith.constant dense<0xFF800000> : vector<32x8xf32>
    %37 = vector.multi_reduction <maximumf>, %36, %cst_5 [2] : vector<32x8x8xf32> to vector<32x8xf32>
    %38 = vector.shape_cast %37 : vector<32x8xf32> to vector<32x8x1xf32>
    %39 = vector.broadcast %38 : vector<32x8x1xf32> to vector<32x8x8xf32>
    %40 = arith.subf %36, %39 : vector<32x8x8xf32>
    %41 = math.exp %40 : vector<32x8x8xf32>
    %cst_6 = arith.constant dense<0.000000e+00> : vector<32x8xf32>
    %42 = vector.multi_reduction <add>, %41, %cst_6 [2] : vector<32x8x8xf32> to vector<32x8xf32>
    %43 = vector.shape_cast %42 : vector<32x8xf32> to vector<32x8x1xf32>
    %44 = tpu.reciprocal %43 : vector<32x8x1xf32> -> vector<32x8x1xf32>
    %45 = vector.broadcast %44 : vector<32x8x1xf32> to vector<32x8x8xf32>
    %46 = arith.mulf %41, %45 : vector<32x8x8xf32>
    "tpu.trace_start"() <{level = 10 : i32, message = "tqk,tkd->tqd"}> : () -> ()
    %cst_7 = arith.constant dense<0.000000e+00> : vector<32x8x4xf32>
    %47 = tpu.matmul %46, %35, %cst_7 {dimension_numbers = #tpu.dot_dimension_numbers<[2], [1], [1], [2], [0, 0, 0, 1, 1, 2], [0], [0]>} : vector<32x8x8xf32>, vector<32x8x4xf32>, vector<32x8x4xf32> -> vector<32x8x4xf32>
    "tpu.trace_stop"() : () -> ()
    %48 = vector.extract_strided_slice %47 {offsets = [0, 0, 0], sizes = [4, 8, 4], strides = [1, 1, 1]} : vector<32x8x4xf32> to vector<4x8x4xf32>
    %49 = vector.extract_strided_slice %47 {offsets = [4, 0, 0], sizes = [4, 8, 4], strides = [1, 1, 1]} : vector<32x8x4xf32> to vector<4x8x4xf32>
    %50 = vector.extract_strided_slice %47 {offsets = [8, 0, 0], sizes = [4, 8, 4], strides = [1, 1, 1]} : vector<32x8x4xf32> to vector<4x8x4xf32>
    %51 = vector.extract_strided_slice %47 {offsets = [12, 0, 0], sizes = [4, 8, 4], strides = [1, 1, 1]} : vector<32x8x4xf32> to vector<4x8x4xf32>
    %52 = vector.extract_strided_slice %47 {offsets = [16, 0, 0], sizes = [4, 8, 4], strides = [1, 1, 1]} : vector<32x8x4xf32> to vector<4x8x4xf32>
    %53 = vector.extract_strided_slice %47 {offsets = [20, 0, 0], sizes = [4, 8, 4], strides = [1, 1, 1]} : vector<32x8x4xf32> to vector<4x8x4xf32>
    %54 = vector.extract_strided_slice %47 {offsets = [24, 0, 0], sizes = [4, 8, 4], strides = [1, 1, 1]} : vector<32x8x4xf32> to vector<4x8x4xf32>
    %55 = vector.extract_strided_slice %47 {offsets = [28, 0, 0], sizes = [4, 8, 4], strides = [1, 1, 1]} : vector<32x8x4xf32> to vector<4x8x4xf32>
    %56 = tpu.concatenate %48, %49, %50, %51, %52, %53, %54, %55 in 2 : vector<4x8x4xf32>, vector<4x8x4xf32>, vector<4x8x4xf32>, vector<4x8x4xf32>, vector<4x8x4xf32>, vector<4x8x4xf32>, vector<4x8x4xf32>, vector<4x8x4xf32> -> vector<4x8x32xf32>
    %c0_8 = arith.constant 0 : index
    %c0_9 = arith.constant 0 : index
    %c0_10 = arith.constant 0 : index
    %57 = vector.load %arg3[%c0_8, %c0_9, %c0_10] : memref<4x8x32xf32, #tpu.memory_space<vmem>>, vector<4x8x32xf32>
    tpu.vector_store %arg3[%c0_8, %c0_9, %c0_10], %56 {strides = array<i32>} : memref<4x8x32xf32, #tpu.memory_space<vmem>>, vector<4x8x32xf32>,
    return
  }
  func.func @transform_0(%arg0: i32) -> (i32, i32) {
    %c0_i32 = arith.constant 0 : i32
    %c0_i32_0 = arith.constant 0 : i32
    return %arg0, %c0_i32 : i32, i32
  }
  func.func @transform_1(%arg0: i32) -> (i32, i32) {
    %c0_i32 = arith.constant 0 : i32
    %c0_i32_0 = arith.constant 0 : i32
    %c0_i32_1 = arith.constant 0 : i32
    return %c0_i32, %c0_i32_0 : i32, i32
  }
  func.func @transform_2(%arg0: i32) -> (i32, i32, i32) {
    %c0_i32 = arith.constant 0 : i32
    %c0_i32_0 = arith.constant 0 : i32
    %c0_i32_1 = arith.constant 0 : i32
    return %arg0, %c0_i32, %c0_i32_0 : i32, i32, i32
  }
}

</mosaic_0001>

<bundles_post_ra>
// kernel: tpu_custom_call.1
= control target key start
LH: loop header
LB: loop body
LE: loop exit
PB: predicated region body
PF: predicated region fallthrough
CT: control target
= control target key end

     0   :  { %7 = vsyncpa [#allocation3], 0  ;;  %s7925_s0 = inlined_call_operand.vmem [shape: f32[64,16], index: 0, kind: input, shape index: {}]   ;;  %s7926_s1 = inlined_call_operand.vmem [shape: f32[16,96], index: 1, kind: input, shape index: {}]   ;;  %s7927_s2 = inlined_call_operand.hbm [shape: f32[8,8,32], index: 2, kind: output, shape index: {}]  }
   0x1   :  { %9 = vsyncpa [#allocation3 + $0x1], 0  ;;  %s6682_s9 = smov 0   ;;  %s6684_s10 = smov 0  }
   0x2   :  { %s6686_s11 = smov 0   ;;  %s6688_s12 = smov 0  }
   0x3 LB: > { %s6703_s13 = sadd.s32 4294967295, %s6645_s12   ;;  %s5816_s14 = sadd.s32 4294967294, %s6645_s12   ;;  %s6645_s12 = sphi %s6688_s12, %s7956_s12   ;;  %s6641_s11 = sphi %s6686_s11, %s7955_s11   ;;  %s6637_s10 = sphi %s6684_s10, %s7954_s10   ;;  %s6633_s9 = sphi %s6682_s9, %s7953_s9  }
   0x4   : > { %s6707_s15 = sadd.s32 1, %s6645_s12   ;;  %s69_s16 = sadd.s32 1, %s6641_s11 }
   0x5   : > { %s66_s17 = ssub.s32 %s6645_s12, %s6707_s15  ;;  %p79_p0 = scmp.ne.s32.totalorder %s6641_s11, %s6637_s10 }
   0x6   : > { %p67_p1 = scmp.eq.s32.totalorder %s66_s17, 0  ;;  %p80_p2 = scmp.eq.s32.totalorder %s6703_s13, 1 }
   0x7   : > { %p85_p3 = scmp.ne.s32.totalorder %s6637_s10, %s6633_s9  ;;  %p86_p4 = scmp.eq.s32.totalorder %s5816_s14, 1 }
   0x8   : > { %s6718_s18 = scalar_select %p67_p1, %s6641_s11, %s69_s16  }
   0x9   : > { %p6720_p5 = por %p80_p2, %p79_p0  ;;  %p6724_p6 = por %p86_p4, %p85_p3 }
   0xa   : > { %p5819_p7 = scmp.ge.s32.totalorder %s6645_s12, 1  ;;  %p116_p8 = scmp.lt.s32.totalorder %s6645_s12, 3 }
   0xc   : > { %p117_p9 = pnand %p5819_p7, %p116_p8 }
   0xe   : > { %120 = sbr.rel (%p117_p9) target bundleno = 1474 (0x5c2), region = 28 }
  0x15   : > { %v149_v0 = vld [vmem:[%s7926_s1] sm:$0xff]  ;;  %v150_v1 = vld [vmem:[%s7926_s1 + $0x8] sm:$0xff]  ;;  %s5821_s25 = sshll.u32 %s6703_s13, 2  ;;  %vm151_vm0 = vcmask 130048   ;;  %s6647_s30 = smov 120   ;;  %v7928_v11 = vmov 0.0  }
  0x16   : > { %v6393_v2 = vpack.c.bf16 %v150_v1, %v149_v0  ;;  %p139_p10 = scmp.lt.s32.totalorder %s5821_s25, 7  ;;  %s6648_s3 = smov 124   ;;  %6073 = vmatprep.subr.mxu1 %v7928_v11  ;;  %vm6656_vm1 = vmmov 0   ;;  %vm375_vm2 = vcmask 31744   ;;  %vm2806_vm3 = vcmask 64512  }
  0x17   : > { %s6649_s4 = smov 116   ;;  %s6650_s5 = smov 100   ;;  %6075 = vmatprep.mubr.msk.f32.mxu1 %vm6656_vm1, %v7928_v11  ;;  %vm5711_vm4 = vcmask 97280   ;;  %vm5720_vm5 = vcmask 162816   ;;  %vm5725_vm6 = vcmask 195584   ;;  %vm5730_vm7 = vcmask 228352  }
  0x18   : > { %6394 = vmatprep.subr.bf16.mxu0 %v6393_v2  ;;  %s7958_s25 = smov (!%p139_p10, %s5821_s25), 7  ;;  %s6651_s6 = smov 112   ;;  %vm5735_vm8 = vcmask 261120  }
  0x19   : > { %6396 = vmatpush3.bf16.msra.mxu0 %v6393_v2  ;;  %s5822_s26 = sshll.u32 %s7958_s25, 3  ;;  %s6652_s7 = smov 108  }
  0x1a   : > { %s142_s29 = scalar_lea.vmem %s7925_s0, %s5822_s26  ;;  %s6653_s8 = smov 104   ;;  %6083 = vmatprep.subr.mxu0 %v7928_v11 }
  0x1b   : > { %v145_v3 = vld [vmem:[%s142_s29] sm:$0xff]  ;;  %v146_v4 = vld [vmem:[%s142_s29 + $0x8] sm:$0xff]  ;;  %v147_v5 = vld [vmem:[%s142_s29 + $0x10] sm:$0xff]  ;;  %s6655_s14 = smov 96   ;;  %s6657_s16 = smov 64  }
  0x1c   : > { %6067 = vmatprep.mubr.msk.f32.mxu0 %vm151_vm0, %v145_v3  ;;  %v148_v6 = vld [vmem:[%s142_s29 + $0x18] sm:$0xff]  ;;  %s6658_s17 = smov 4   ;;  %s6659_s21 = smov 8  }
  0x1d   : > { %6068 = vmatmul.mubr.msk.f32.vlgmr.msra.gmra.mrb[0].mxu0 %vm151_vm0, %v146_v4  ;;  %s6660_s22 = smov 12   ;;  %s6661_s23 = smov 16  }
  0x1e   : > { %6070 = vmatprep.mubr.msk.f32.mxu0 %vm151_vm0, %v147_v5  ;;  %s6662_s24 = smov 20   ;;  %s6663_s25 = smov 24  }
  0x1f   : > { %s6664_s26 = smov 28   ;;  %s135_s27 = sand.u32 1, %s6637_s10  }
  0x20   : > { %s5820_s28 = sshll.u32 %s135_s27, 5 }
  0x21   : > { %6071 = vmatmul.mubr.msk.f32.gmra.mrb[2].mxu0 %vm151_vm0, %v148_v6  ;;  %s7843_s29 = scalar_lea.vmem [#allocation2], %s5820_s28 }
  0x22   : > { %6085 = vmatprep.mubr.msk.f32.mxu0 %vm6656_vm1, %v7928_v11 }
  0xf0   : > { %v6744_v7 = vpop.f32.mrb[0].mxu0 }
  0xf1   : > { %327 = vrot.lane.b32.xlu1 %v6744_v7, %s6647_s30  ;;  %319 = vrot.lane.b32.xlu0 %v6744_v7, %s6648_s3  ;;  %v6750_v8 = vpop.f32.mrb[1].mxu0  ;;  %v6826_v13 = vmul.f32 0.5, %v6744_v7 }
  0xf2   : > { %v6795_v12 = vmul.f32 0.5, %v6750_v8 }
  0xf4   : > { %v6752_v9 = vpop.f32.mrb[2].mxu0 }
  0xf5   : > { %335 = vrot.lane.b32.xlu1 %v6744_v7, %s6649_s4  ;;  %367 = vrot.lane.b32.xlu0 %v6744_v7, %s6650_s5  ;;  %v6758_v10 = vpop.f32.mrb[3].mxu0  ;;  %v6849_v14 = vmul.f32 0.5, %v6752_v9 }
  0xf6   : > { %v6852_v15 = vmul.f32 0.5, %v6758_v10 }
  0xf9   : > { %343 = vrot.lane.b32.xlu1 %v6744_v7, %s6651_s6  ;;  %317 = vrot.lane.b32.xlu0 %v6750_v8, %s6648_s3 }
  0xfd   : > { %351 = vrot.lane.b32.xlu1 %v6744_v7, %s6652_s7  ;;  %325 = vrot.lane.b32.xlu0 %v6750_v8, %s6647_s30 }
 0x101   : > { %359 = vrot.lane.b32.xlu1 %v6744_v7, %s6653_s8  ;;  %333 = vrot.lane.b32.xlu0 %v6750_v8, %s6649_s4 }
 0x105   : > { %450 = vrot.lane.b32.xlu1 %v6744_v7, %s6655_s14  ;;  %341 = vrot.lane.b32.xlu0 %v6750_v8, %s6651_s6 }
 0x109   : > { %365 = vrot.lane.b32.xlu1 %v6750_v8, %s6650_s5  ;;  %349 = vrot.lane.b32.xlu0 %v6750_v8, %s6652_s7 }
 0x10d   : > { %357 = vrot.lane.b32.xlu0 %v6750_v8, %s6653_s8  ;;  %323 = vrot.lane.b32.xlu1 %v6752_v9, %s6648_s3 }
 0x111   : > { %373 = vrot.lane.b32.xlu0 %v6750_v8, %s6655_s14  ;;  %331 = vrot.lane.b32.xlu1 %v6752_v9, %s6647_s30 }
 0x115   : > { %257 = vrot.lane.b32.xlu0 %v6795_v12, %s6648_s3  ;;  %339 = vrot.lane.b32.xlu1 %v6752_v9, %s6649_s4 }
 0x119   : > { %265 = vrot.lane.b32.xlu0 %v6795_v12, %s6647_s30  ;;  %347 = vrot.lane.b32.xlu1 %v6752_v9, %s6651_s6 }
 0x11d   : > { %273 = vrot.lane.b32.xlu0 %v6795_v12, %s6649_s4  ;;  %355 = vrot.lane.b32.xlu1 %v6752_v9, %s6652_s7 }
 0x121   : > { %281 = vrot.lane.b32.xlu0 %v6795_v12, %s6651_s6  ;;  %363 = vrot.lane.b32.xlu1 %v6752_v9, %s6653_s8 }
 0x125   : > { %289 = vrot.lane.b32.xlu0 %v6795_v12, %s6652_s7  ;;  %371 = vrot.lane.b32.xlu1 %v6752_v9, %s6650_s5 }
 0x129   : > { %602 = vrot.lane.b32.xlu1 %v6752_v9, %s6655_s14  ;;  %329 = vrot.lane.b32.xlu0 %v6758_v10, %s6647_s30 }
 0x12d   : > { %337 = vrot.lane.b32.xlu0 %v6758_v10, %s6649_s4  ;;  %321 = vrot.lane.b32.xlu1 %v6758_v10, %s6648_s3 }
 0x131   : > { %345 = vrot.lane.b32.xlu0 %v6758_v10, %s6651_s6  ;;  %259 = vrot.lane.b32.xlu1 %v6826_v13, %s6648_s3 }
 0x135   : > { %353 = vrot.lane.b32.xlu0 %v6758_v10, %s6652_s7  ;;  %267 = vrot.lane.b32.xlu1 %v6826_v13, %s6647_s30 }
 0x139   : > { %361 = vrot.lane.b32.xlu0 %v6758_v10, %s6653_s8  ;;  %275 = vrot.lane.b32.xlu1 %v6826_v13, %s6649_s4 }
 0x13d   : > { %369 = vrot.lane.b32.xlu0 %v6758_v10, %s6650_s5  ;;  %283 = vrot.lane.b32.xlu1 %v6826_v13, %s6651_s6 }
 0x141   : > { %526 = vrot.lane.b32.xlu0 %v6758_v10, %s6655_s14  ;;  %291 = vrot.lane.b32.xlu1 %v6826_v13, %s6652_s7 }
 0x145   : > { %263 = vrot.lane.b32.xlu1 %v6849_v14, %s6648_s3  ;;  %261 = vrot.lane.b32.xlu0 %v6852_v15, %s6648_s3  ;;  %s5928_s3 = sshll.u32 %s6703_s13, 9  ;;  %s7883_s13 = scalar_lea.sflag [#allocation3], %s135_s27 }
 0x149   : > { %271 = vrot.lane.b32.xlu1 %v6849_v14, %s6647_s30  ;;  %269 = vrot.lane.b32.xlu0 %v6852_v15, %s6647_s30  ;;  %s5754_s30 = sshll.u32 %s7843_s29, 4  ;;  %s7869_s30 = int_to_ptr.vmem [resolvable:$true] %s5754_s30 }
 0x14d   : > { %279 = vrot.lane.b32.xlu1 %v6849_v14, %s6649_s4  ;;  %277 = vrot.lane.b32.xlu0 %v6852_v15, %s6649_s4 }
 0x151   : > { %287 = vrot.lane.b32.xlu1 %v6849_v14, %s6651_s6  ;;  %285 = vrot.lane.b32.xlu0 %v6852_v15, %s6651_s6  ;;  %s7876_s6 = scalar_lea.hbm %s7927_s2, %s5928_s3 }
 0x163   : > { %v6870_v16 = vpop.permute.xlu1 %327  ;;  %v6872_v17 = vpop.permute.xlu0 %319 }
 0x164   : > { %754 = vrot.lane.b32.xlu1 %v6872_v17, %s6655_s14 }
 0x167   : > { %v6876_v18 = vpop.permute.xlu1 %335  ;;  %v6878_v19 = vpop.permute.xlu0 %367 }
 0x168   : > { %1058 = vrot.lane.b32.xlu1 %v6870_v16, %s6655_s14 }
 0x16b   : > { %v6882_v20 = vpop.permute.xlu1 %343  ;;  %v6884_v21 = vpop.permute.xlu0 %317 }
 0x16c   : > { %1362 = vrot.lane.b32.xlu1 %v6876_v18, %s6655_s14  ;;  %678 = vrot.lane.b32.xlu0 %v6884_v21, %s6655_s14 }
 0x16f   : > { %v6890_v22 = vpop.permute.xlu1 %351  ;;  %v6892_v23 = vpop.permute.xlu0 %325 }
 0x170   : > { %1666 = vrot.lane.b32.xlu1 %v6882_v20, %s6655_s14  ;;  %982 = vrot.lane.b32.xlu0 %v6892_v23, %s6655_s14 }
 0x173   : > { %v6898_v24 = vpop.permute.xlu1 %359  ;;  %v6900_v25 = vpop.permute.xlu0 %333 }
 0x174   : > { %1970 = vrot.lane.b32.xlu1 %v6890_v22, %s6655_s14  ;;  %1286 = vrot.lane.b32.xlu0 %v6900_v25, %s6655_s14 }
 0x177   : > { %v451_v26 = vpop.permute.xlu1 %450  ;;  %v6906_v27 = vpop.permute.xlu0 %341 }
 0x178   : > { %1590 = vrot.lane.b32.xlu0 %v6906_v27, %s6655_s14 }
 0x17b   : > { %v6910_v28 = vpop.permute.xlu1 %365  ;;  %v6912_v29 = vpop.permute.xlu0 %349 }
 0x17c   : > { %1894 = vrot.lane.b32.xlu0 %v6912_v29, %s6655_s14 }
 0x17f   : > { %v6916_v30 = vpop.permute.xlu0 %357  ;;  %v6918_v31 = vpop.permute.xlu1 %323 }
 0x180   : > { %906 = vrot.lane.b32.xlu1 %v6918_v31, %s6655_s14 }
 0x183   : > { %v374_v32 = vpop.permute.xlu0 %373  ;;  %v6922_v33 = vpop.permute.xlu1 %331 }
 0x184   : > { %6074 = vmatpush3.xpose.msk.msra.mxu1 %vm375_vm2, %v374_v32  ;;  %1210 = vrot.lane.b32.xlu1 %v6922_v33, %s6655_s14 }
 0x185   : > { %6078 = vmatprep.subr.mxu1 %v7928_v11 }
 0x187   : > { %v6928_v34 = vpop.permute.xlu0 %257  ;;  %6076 = vmatmul.mubr.msk.f32.vlgmr.msra.gmra.mrb[0].mxu1 %vm375_vm2, %v6795_v12  ;;  %v6932_v35 = vpop.permute.xlu1 %339 }
 0x188   : > { %6079 = vmatpush3.xpose.msk.msra.mxu1 %vm375_vm2, %v451_v26  ;;  %1514 = vrot.lane.b32.xlu1 %v6932_v35, %s6655_s14 }
 0x189   : > { %6080 = vmatprep.mubr.msk.f32.mxu1 %vm6656_vm1, %v7928_v11  ;;  %6088 = vmatprep.subr.mxu1 %v7928_v11 }
 0x18b   : > { %v6940_v36 = vpop.permute.xlu0 %265  ;;  %6081 = vmatmul.mubr.msk.f32.vlgmr.msra.gmra.mrb[2].mxu1 %vm375_vm2, %v6826_v13  ;;  %v6944_v37 = vpop.permute.xlu1 %347 }
 0x18c   : > { %1818 = vrot.lane.b32.xlu1 %v6944_v37, %s6655_s14  ;;  %6090 = vmatprep.mubr.msk.f32.mxu1 %vm6656_vm1, %v7928_v11 }
 0x18f   : > { %v6950_v38 = vpop.permute.xlu0 %273  ;;  %v6952_v39 = vpop.permute.xlu1 %355 }
 0x190   : > { %2122 = vrot.lane.b32.xlu1 %v6952_v39, %s6655_s14 }
 0x193   : > { %v6956_v40 = vpop.permute.xlu0 %281  ;;  %v6958_v41 = vpop.permute.xlu1 %363 }
 0x194   : > { %295 = vrot.lane.b32.xlu1 %v6849_v14, %s6652_s7 }
 0x197   : > { %v6962_v42 = vpop.permute.xlu0 %289  ;;  %v6964_v43 = vpop.permute.xlu1 %371 }
 0x198   : > { %2274 = vrot.lane.b32.xlu1 %v6898_v24, %s6655_s14 }
 0x19b   : > { %v603_v44 = vpop.permute.xlu1 %602  ;;  %v330_v45 = vpop.permute.xlu0 %329 }
 0x19c   : > { %6089 = vmatpush3.xpose.msk.msra.mxu1 %vm375_vm2, %v603_v44  ;;  %299 = vrot.lane.b32.xlu1 %v6826_v13, %s6653_s8 }
 0x19d   : > { %6098 = vmatprep.subr.mxu1 %v7928_v11 }
 0x19f   : > { %6091 = vmatmul.mubr.msk.f32.vlgmr.msra.gmra.mrb[4].mxu1 %vm375_vm2, %v6849_v14  ;;  %v338_v46 = vpop.permute.xlu0 %337  ;;  %v322_v47 = vpop.permute.xlu1 %321 }
 0x1a0   : > { %2426 = vrot.lane.b32.xlu1 %v6958_v41, %s6655_s14  ;;  %830 = vrot.lane.b32.xlu0 %v322_v47, %s6655_s14 }
 0x1a1   : > { %6100 = vmatprep.mubr.msk.f32.mxu1 %vm6656_vm1, %v7928_v11 }
 0x1a3   : > { %v346_v48 = vpop.permute.xlu0 %345  ;;  %v260_v49 = vpop.permute.xlu1 %259 }
 0x1a4   : > { %303 = vrot.lane.b32.xlu1 %v6849_v14, %s6653_s8  ;;  %293 = vrot.lane.b32.xlu0 %v6852_v15, %s6652_s7  ;;  %s6583_s7 = scalar_lea.vmem %s7869_s30, 512 }
 0x1a5   : > { %p6584_p11 = scmp.ne.s32.totalorder %s7869_s30, %s6583_s7 }
 0x1a7   : > { %v6983_v50 = vpop.permute.xlu0 %353  ;;  %v6985_v51 = vpop.permute.xlu1 %267  ;;  %p6585_p12 = pnand %p6584_p11, %p6720_p5 }
 0x1a8   : > { %2578 = vrot.lane.b32.xlu1 %v6878_v19, %s6655_s14  ;;  %1134 = vrot.lane.b32.xlu0 %v330_v45, %s6655_s14 }
 0x1a9   : > { %p6586_p13 = pneg %p6585_p12 }
 0x1ab   : > { %v6990_v52 = vpop.permute.xlu0 %361  ;;  %v6996_v53 = vpop.permute.xlu1 %275 }
 0x1ac   : > { %307 = vrot.lane.b32.xlu1 %v6826_v13, %s6650_s5  ;;  %2198 = vrot.lane.b32.xlu0 %v6916_v30, %s6655_s14 }
 0x1af   : > { %v6998_v54 = vpop.permute.xlu0 %369  ;;  %v7003_v56 = vpop.permute.xlu1 %283 }
 0x1b0   : > { %2730 = vrot.lane.b32.xlu1 %v6964_v43, %s6655_s14  ;;  %1438 = vrot.lane.b32.xlu0 %v338_v46, %s6655_s14 }
 0x1b3   : > { %v527_v55 = vpop.permute.xlu0 %526  ;;  %v7018_v57 = vpop.permute.xlu1 %291 }
 0x1b4   : > { %6084 = vmatpush3.xpose.msk.msra.mxu0 %vm375_vm2, %v527_v55  ;;  %311 = vrot.lane.b32.xlu1 %v6849_v14, %s6650_s5 }
 0x1b5   : > { %297 = vrot.lane.b32.xlu0 %v6795_v12, %s6653_s8  ;;  %6093 = vmatprep.subr.mxu0 %v7928_v11 }
 0x1b7   : > { %6086 = vmatmul.mubr.msk.f32.vlgmr.msra.gmra.mrb[4].mxu0 %vm375_vm2, %v6852_v15  ;;  %v264_v58 = vpop.permute.xlu1 %263  ;;  %v7032_v60 = vpop.permute.xlu0 %261 }
 0x1b8   : > { %3159 = vrot.lane.b32.xlu1 %v6750_v8, %s6657_s16  ;;  %6095 = vmatprep.mubr.msk.f32.mxu0 %vm6656_vm1, %v7928_v11 }
 0x1b9   : > { %1742 = vrot.lane.b32.xlu0 %v346_v48, %s6655_s14 }
 0x1bb   : > { %v272_v59 = vpop.permute.xlu1 %271  ;;  %v7044_v62 = vpop.permute.xlu0 %269 }
 0x1bc   : > { %3311 = vrot.lane.b32.xlu1 %v6758_v10, %s6657_s16 }
 0x1bd   : > { %301 = vrot.lane.b32.xlu0 %v6852_v15, %s6653_s8  ;;  %s6665_s8 = smov [#allocation2]  }
 0x1bf   : > { %v7038_v61 = vpop.permute.xlu1 %279  ;;  %v7051_v0 = vpop.permute.xlu0 %277 }
 0x1c0   : > { %3463 = vrot.lane.b32.xlu1 %v6884_v21, %s6657_s16 }
 0x1c1   : > { %2046 = vrot.lane.b32.xlu0 %v6983_v50, %s6655_s14 }
 0x1c3   : > { %v7049_v63 = vpop.permute.xlu1 %287  ;;  %v7061_v2 = vpop.permute.xlu0 %285 }
 0x1c4   : > { %3767 = vrot.lane.b32.xlu1 %v6892_v23, %s6657_s16 }
 0x1c5   : > { %2502 = vrot.lane.b32.xlu0 %v6910_v28, %s6655_s14 }
 0x1c8   : > { %4071 = vrot.lane.b32.xlu1 %v6900_v25, %s6657_s16 }
 0x1c9   : > { %2350 = vrot.lane.b32.xlu0 %v6990_v52, %s6655_s14 }
 0x1cc   : > { %4375 = vrot.lane.b32.xlu1 %v6906_v27, %s6657_s16 }
 0x1cd   : > { %305 = vrot.lane.b32.xlu0 %v6795_v12, %s6650_s5 }
 0x1d0   : > { %3615 = vrot.lane.b32.xlu1 %v322_v47, %s6657_s16 }
 0x1d1   : > { %2654 = vrot.lane.b32.xlu0 %v6998_v54, %s6655_s14  ;;  %s6587_s14 = sshll.u32 %s6665_s8, 4  ;;  %s6588_s14 = int_to_ptr.vmem [resolvable:$false] %s6587_s14 }
 0x1d2   : > { %p6590_p0 = scmp.lt.s32.totalorder %s7869_s30, %s6588_s14 }
 0x1d4   : > { %3919 = vrot.lane.b32.xlu1 %v330_v45, %s6657_s16 }
 0x1d5   : > { %309 = vrot.lane.b32.xlu0 %v6852_v15, %s6650_s5 }
 0x1d6   : > { %v755_v1 = vpop.permute.xlu1 %754 }
 0x1d7   : > { %6099 = vmatpush3.xpose.msk.msra.mxu1 %vm375_vm2, %v755_v1 }
 0x1d8   : > { %4223 = vrot.lane.b32.xlu1 %v338_v46, %s6657_s16  ;;  %6108 = vmatprep.subr.mxu1 %v7928_v11 }
 0x1d9   : > { %3235 = vrot.lane.b32.xlu0 %v6744_v7, %s6657_s16 }
 0x1da   : > { %6101 = vmatmul.mubr.msk.f32.vlgmr.msra.gmra.mrb[6].mxu1 %vm375_vm2, %v260_v49  ;;  %v1059_v3 = vpop.permute.xlu1 %1058 }
 0x1db   : > { %6110 = vmatprep.mubr.msk.f32.mxu1 %vm6656_vm1, %v7928_v11 }
 0x1dc   : > { %4527 = vrot.lane.b32.xlu1 %v346_v48, %s6657_s16 }
 0x1dd   : > { %3387 = vrot.lane.b32.xlu0 %v6752_v9, %s6657_s16 }
 0x1de   : > { %v679_v4 = vpop.permute.xlu0 %678  ;;  %v1363_v5 = vpop.permute.xlu1 %1362 }
 0x1df   : > { %6094 = vmatpush3.xpose.msk.msra.mxu0 %vm375_vm2, %v679_v4 }
 0x1e0   : > { %4679 = vrot.lane.b32.xlu1 %v6912_v29, %s6657_s16  ;;  %6103 = vmatprep.subr.mxu0 %v7928_v11 }
 0x1e1   : > { %3539 = vrot.lane.b32.xlu0 %v6872_v17, %s6657_s16 }
 0x1e2   : > { %6096 = vmatmul.mubr.msk.f32.vlgmr.msra.gmra.mrb[6].mxu0 %vm375_vm2, %v6928_v34  ;;  %v1667_v6 = vpop.permute.xlu1 %1666  ;;  %v983_v12 = vpop.permute.xlu0 %982 }
 0x1e3   : > { %6105 = vmatprep.mubr.msk.f32.mxu0 %vm6656_vm1, %v7928_v11 }
 0x1e4   : > { %4755 = vrot.lane.b32.xlu1 %v6890_v22, %s6657_s16 }
 0x1e5   : > { %3691 = vrot.lane.b32.xlu0 %v6918_v31, %s6657_s16 }
 0x1e6   : > { %v1971_v7 = vpop.permute.xlu1 %1970  ;;  %v1287_v14 = vpop.permute.xlu0 %1286 }
 0x1e8   : > { %4907 = vrot.lane.b32.xlu1 %v6952_v39, %s6657_s16 }
 0x1e9   : > { %3843 = vrot.lane.b32.xlu0 %v6870_v16, %s6657_s16 }
 0x1ea   : > { %v7134_v17 = vpop.permute.xlu0 %1590 }
 0x1ec   : > { %5059 = vrot.lane.b32.xlu1 %v6898_v24, %s6657_s16 }
 0x1ed   : > { %3995 = vrot.lane.b32.xlu0 %v6922_v33, %s6657_s16 }
 0x1f0   : > { %5211 = vrot.lane.b32.xlu1 %v6958_v41, %s6657_s16 }
 0x1f1   : > { %4147 = vrot.lane.b32.xlu0 %v6876_v18, %s6657_s16 }
 0x1f2   : > { %v907_v8 = vpop.permute.xlu1 %906 }
 0x1f3   : > { %6109 = vmatpush3.xpose.msk.msra.mxu1 %vm375_vm2, %v907_v8 }
 0x1f4   : > { %6118 = vmatprep.subr.mxu1 %v7928_v11 }
 0x1f5   : > { %4299 = vrot.lane.b32.xlu0 %v6932_v35, %s6657_s16 }
 0x1f6   : > { %6111 = vmatmul.mubr.msk.f32.vlgmr.msra.gmra.mrb[8].mxu1 %vm375_vm2, %v264_v58  ;;  %v1211_v9 = vpop.permute.xlu1 %1210 }
 0x1f7   : > { %6119 = vmatpush3.xpose.msk.msra.mxu1 %vm375_vm2, %v1059_v3  ;;  %6120 = vmatprep.mubr.msk.f32.mxu1 %vm6656_vm1, %v7928_v11 }
 0x1f8   : > { %6128 = vmatprep.subr.mxu1 %v7928_v11 }
 0x1f9   : > { %4451 = vrot.lane.b32.xlu0 %v6882_v20, %s6657_s16  ;;  %v7145_v20 = vpop.permute.xlu0 %1894 }
 0x1fa   : > { %6121 = vmatmul.mubr.msk.f32.vlgmr.msra.gmra.mrb[10].mxu1 %vm375_vm2, %v6985_v51  ;;  %v1515_v10 = vpop.permute.xlu1 %1514 }
 0x1fb   : > { %6129 = vmatpush3.xpose.msk.msra.mxu1 %vm375_vm2, %v1211_v9  ;;  %6130 = vmatprep.mubr.msk.f32.mxu1 %vm6656_vm1, %v7928_v11 }
 0x1fc   : > { %6138 = vmatprep.subr.mxu1 %v7928_v11 }
 0x1fd   : > { %4603 = vrot.lane.b32.xlu0 %v6944_v37, %s6657_s16 }
 0x1fe   : > { %6131 = vmatmul.mubr.msk.f32.vlgmr.msra.gmra.mrb[12].mxu1 %vm375_vm2, %v272_v59  ;;  %v1819_v13 = vpop.permute.xlu1 %1818 }
 0x1ff   : > { %6139 = vmatpush3.xpose.msk.msra.mxu1 %vm375_vm2, %v1363_v5  ;;  %6140 = vmatprep.mubr.msk.f32.mxu1 %vm6656_vm1, %v7928_v11 }
 0x200   : > { %6148 = vmatprep.subr.mxu1 %v7928_v11 }
 0x201   : > { %4831 = vrot.lane.b32.xlu0 %v6983_v50, %s6657_s16 }
 0x202   : > { %6141 = vmatmul.mubr.msk.f32.vlgmr.msra.gmra.mrb[14].mxu1 %vm375_vm2, %v6996_v53  ;;  %v2123_v15 = vpop.permute.xlu1 %2122 }
 0x203   : > { %6149 = vmatpush3.xpose.msk.msra.mxu1 %vm375_vm2, %v1515_v10  ;;  %6150 = vmatprep.mubr.msk.f32.mxu1 %vm6656_vm1, %v7928_v11 }
 0x204   : > { %6158 = vmatprep.subr.mxu1 %v7928_v11 }
 0x205   : > { %4983 = vrot.lane.b32.xlu0 %v6916_v30, %s6657_s16 }
 0x206   : > { %6151 = vmatmul.mubr.msk.f32.vlgmr.msra.gmra.mrb[16].mxu1 %vm375_vm2, %v7038_v61  ;;  %v296_v16 = vpop.permute.xlu1 %295 }
 0x207   : > { %6159 = vmatpush3.xpose.msk.msra.mxu1 %vm375_vm2, %v1667_v6  ;;  %6160 = vmatprep.mubr.msk.f32.mxu1 %vm6656_vm1, %v7928_v11 }
 0x208   : > { %6168 = vmatprep.subr.mxu1 %v7928_v11 }
 0x209   : > { %5135 = vrot.lane.b32.xlu0 %v6990_v52, %s6657_s16 }
 0x20a   : > { %6161 = vmatmul.mubr.msk.f32.vlgmr.msra.gmra.mrb[18].mxu1 %vm375_vm2, %v7003_v56  ;;  %v2275_v18 = vpop.permute.xlu1 %2274 }
 0x20b   : > { %6169 = vmatpush3.xpose.msk.msra.mxu1 %vm375_vm2, %v1819_v13  ;;  %6170 = vmatprep.mubr.msk.f32.mxu1 %vm6656_vm1, %v7928_v11 }
 0x20c   : > { %6178 = vmatprep.subr.mxu1 %v7928_v11 }
 0x20e   : > { %6171 = vmatmul.mubr.msk.f32.vlgmr.msra.gmra.mrb[20].mxu1 %vm375_vm2, %v7049_v63  ;;  %v300_v21 = vpop.permute.xlu1 %299 }
 0x20f   : > { %6179 = vmatpush3.xpose.msk.msra.mxu1 %vm375_vm2, %v1971_v7  ;;  %6180 = vmatprep.mubr.msk.f32.mxu1 %vm6656_vm1, %v7928_v11 }
 0x210   : > { %6188 = vmatprep.subr.mxu1 %v7928_v11 }
 0x212   : > { %6181 = vmatmul.mubr.msk.f32.vlgmr.msra.gmra.mrb[22].mxu1 %vm375_vm2, %v7018_v57  ;;  %v2427_v22 = vpop.permute.xlu1 %2426  ;;  %v831_v23 = vpop.permute.xlu0 %830 }
 0x213   : > { %6104 = vmatpush3.xpose.msk.msra.mxu0 %vm375_vm2, %v831_v23  ;;  %6189 = vmatpush3.xpose.msk.msra.mxu1 %vm375_vm2, %v2123_v15 }
 0x214   : > { %6190 = vmatprep.mubr.msk.f32.mxu1 %vm6656_vm1, %v7928_v11  ;;  %6198 = vmatprep.subr.mxu1 %v7928_v11 }
 0x215   : > { %6113 = vmatprep.subr.mxu0 %v7928_v11 }
 0x216   : > { %6191 = vmatmul.mubr.msk.f32.vlgmr.msra.gmra.mrb[24].mxu1 %vm375_vm2, %v296_v16  ;;  %v304_v24 = vpop.permute.xlu1 %303  ;;  %v294_v25 = vpop.permute.xlu0 %293  ;;  %6106 = vmatmul.mubr.msk.f32.vlgmr.msra.gmra.mrb[8].mxu0 %vm375_vm2, %v7032_v60 }
 0x217   : > { %6114 = vmatpush3.xpose.msk.msra.mxu0 %vm375_vm2, %v983_v12  ;;  %6199 = vmatpush3.xpose.msk.msra.mxu1 %vm375_vm2, %v2275_v18 }
 0x218   : > { %6115 = vmatprep.mubr.msk.f32.mxu0 %vm6656_vm1, %v7928_v11  ;;  %6200 = vmatprep.mubr.msk.f32.mxu1 %vm6656_vm1, %v7928_v11 }
 0x219   : > { %6208 = vmatprep.subr.mxu1 %v7928_v11  ;;  %6123 = vmatprep.subr.mxu0 %v7928_v11 }
 0x21a   : > { %6201 = vmatmul.mubr.msk.f32.vlgmr.msra.gmra.mrb[26].mxu1 %vm375_vm2, %v300_v21  ;;  %v2579_v26 = vpop.permute.xlu1 %2578  ;;  %v1135_v27 = vpop.permute.xlu0 %1134  ;;  %6116 = vmatmul.mubr.msk.f32.vlgmr.msra.gmra.mrb[10].mxu0 %vm375_vm2, %v6940_v36 }
 0x21b   : > { %6124 = vmatpush3.xpose.msk.msra.mxu0 %vm375_vm2, %v1135_v27  ;;  %6209 = vmatpush3.xpose.msk.msra.mxu1 %vm375_vm2, %v2427_v22 }
 0x21c   : > { %6125 = vmatprep.mubr.msk.f32.mxu0 %vm6656_vm1, %v7928_v11  ;;  %6210 = vmatprep.mubr.msk.f32.mxu1 %vm6656_vm1, %v7928_v11 }
 0x21d   : > { %6218 = vmatprep.subr.mxu1 %v7928_v11  ;;  %6133 = vmatprep.subr.mxu0 %v7928_v11 }
 0x21e   : > { %6211 = vmatmul.mubr.msk.f32.vlgmr.msra.gmra.mrb[28].mxu1 %vm375_vm2, %v304_v24  ;;  %v308_v29 = vpop.permute.xlu1 %307  ;;  %v2199_v30 = vpop.permute.xlu0 %2198  ;;  %6126 = vmatmul.mubr.msk.f32.vlgmr.msra.gmra.mrb[12].mxu0 %vm375_vm2, %v7044_v62 }
 0x21f   : > { %6134 = vmatpush3.xpose.msk.msra.mxu0 %vm375_vm2, %v1287_v14  ;;  %6219 = vmatpush3.xpose.msk.msra.mxu1 %vm375_vm2, %v2579_v26 }
 0x220   : > { %6135 = vmatprep.mubr.msk.f32.mxu0 %vm6656_vm1, %v7928_v11  ;;  %6220 = vmatprep.mubr.msk.f32.mxu1 %vm6656_vm1, %v7928_v11 }
 0x221   : > { %6228 = vmatprep.subr.mxu1 %v7928_v11  ;;  %6143 = vmatprep.subr.mxu0 %v7928_v11 }
 0x222   : > { %6221 = vmatmul.mubr.msk.f32.vlgmr.msra.gmra.mrb[30].mxu1 %vm375_vm2, %v308_v29  ;;  %v2731_v31 = vpop.permute.xlu1 %2730  ;;  %v1439_v32 = vpop.permute.xlu0 %1438  ;;  %6136 = vmatmul.mubr.msk.f32.vlgmr.msra.gmra.mrb[14].mxu0 %vm375_vm2, %v6950_v38 }
 0x223   : > { %6144 = vmatpush3.xpose.msk.msra.mxu0 %vm375_vm2, %v1439_v32  ;;  %6229 = vmatpush3.xpose.msk.msra.mxu1 %vm375_vm2, %v2731_v31 }
 0x224   : > { %6145 = vmatprep.mubr.msk.f32.mxu0 %vm6656_vm1, %v7928_v11  ;;  %6230 = vmatprep.mubr.msk.f32.mxu1 %vm6656_vm1, %v7928_v11 }
 0x225   : > { %6153 = vmatprep.subr.mxu0 %v7928_v11  ;;  %6238 = vmatprep.subr.mxu1 %v7928_v11 }
 0x226   : > { %v312_v33 = vpop.permute.xlu1 %311  ;;  %6146 = vmatmul.mubr.msk.f32.vlgmr.msra.gmra.mrb[16].mxu0 %vm375_vm2, %v7051_v0 }
 0x227   : > { %v298_v34 = vpop.permute.xlu0 %297  ;;  %6154 = vmatpush3.xpose.msk.msra.mxu0 %vm375_vm2, %v7134_v17  ;;  %6231 = vmatmul.mubr.msk.f32.vlgmr.msra.gmra.mrb[32].mxu1 %vm375_vm2, %v312_v33 }
 0x228   : > { %6155 = vmatprep.mubr.msk.f32.mxu0 %vm6656_vm1, %v7928_v11  ;;  %6163 = vmatprep.subr.mxu0 %v7928_v11 }
 0x229   : > { %6240 = vmatprep.mubr.msk.f32.mxu1 %vm6656_vm1, %v7928_v11 }
 0x22a   : > { %6156 = vmatmul.mubr.msk.f32.vlgmr.msra.gmra.mrb[18].mxu0 %vm375_vm2, %v6956_v40  ;;  %v3160_v44 = vpop.permute.xlu1 %3159 }
 0x22b   : > { %v1743_v35 = vpop.permute.xlu0 %1742  ;;  %6165 = vmatprep.mubr.msk.f32.mxu0 %vm6656_vm1, %v7928_v11 }
 0x22c   : > { %6164 = vmatpush3.xpose.msk.msra.mxu0 %vm375_vm2, %v1743_v35 }
 0x22d   : > { %6173 = vmatprep.subr.mxu0 %v7928_v11 }
 0x22e   : > { %v7275_v59 = vpop.permute.xlu1 %3311 }
 0x22f   : > { %v302_v36 = vpop.permute.xlu0 %301  ;;  %6166 = vmatmul.mubr.msk.f32.vlgmr.msra.gmra.mrb[20].mxu0 %vm375_vm2, %v7061_v2 }
 0x230   : > { %6174 = vmatpush3.xpose.msk.msra.mxu0 %vm375_vm2, %v7145_v20  ;;  %6175 = vmatprep.mubr.msk.f32.mxu0 %vm6656_vm1, %v7928_v11 }
 0x231   : > { %6183 = vmatprep.subr.mxu0 %v7928_v11 }
 0x232   : > { %v7277_v60 = vpop.permute.xlu1 %3463 }
 0x233   : > { %v2047_v37 = vpop.permute.xlu0 %2046  ;;  %6176 = vmatmul.mubr.msk.f32.vlgmr.msra.gmra.mrb[22].mxu0 %vm375_vm2, %v6962_v42 }
 0x234   : > { %6184 = vmatpush3.xpose.msk.msra.mxu0 %vm375_vm2, %v2047_v37  ;;  %6185 = vmatprep.mubr.msk.f32.mxu0 %vm6656_vm1, %v7928_v11 }
 0x235   : > { %6193 = vmatprep.subr.mxu0 %v7928_v11 }
 0x236   : > { %v7279_v61 = vpop.permute.xlu1 %3767 }
 0x237   : > { %v2503_v38 = vpop.permute.xlu0 %2502  ;;  %6186 = vmatmul.mubr.msk.f32.vlgmr.msra.gmra.mrb[24].mxu0 %vm375_vm2, %v294_v25 }
 0x238   : > { %6194 = vmatpush3.xpose.msk.msra.mxu0 %vm375_vm2, %v2199_v30  ;;  %6195 = vmatprep.mubr.msk.f32.mxu0 %vm6656_vm1, %v7928_v11 }
 0x239   : > { %6203 = vmatprep.subr.mxu0 %v7928_v11 }
 0x23a   : > { %v7281_v62 = vpop.permute.xlu1 %4071 }
 0x23b   : > { %v2351_v39 = vpop.permute.xlu0 %2350  ;;  %6196 = vmatmul.mubr.msk.f32.vlgmr.msra.gmra.mrb[26].mxu0 %vm375_vm2, %v298_v34  ;;  %7932 = vst [vmem:[#allocation5_spill] sm:$0xff] %v7281_v62 }
 0x23c   : > { %6204 = vmatpush3.xpose.msk.msra.mxu0 %vm375_vm2, %v2351_v39  ;;  %6205 = vmatprep.mubr.msk.f32.mxu0 %vm6656_vm1, %v7928_v11 }
 0x23d   : > { %6213 = vmatprep.subr.mxu0 %v7928_v11 }
 0x23e   : > { %v7287_v2 = vpop.permute.xlu1 %4375 }
 0x23f   : > { %v306_v40 = vpop.permute.xlu0 %305  ;;  %6206 = vmatmul.mubr.msk.f32.vlgmr.msra.gmra.mrb[28].mxu0 %vm375_vm2, %v302_v36  ;;  %7933 = vst [vmem:[#allocation6_spill] sm:$0xff] %v7287_v2 }
 0x240   : > { %6214 = vmatpush3.xpose.msk.msra.mxu0 %vm375_vm2, %v2503_v38  ;;  %6215 = vmatprep.mubr.msk.f32.mxu0 %vm6656_vm1, %v7928_v11 }
 0x241   : > { %6223 = vmatprep.subr.mxu0 %v7928_v11 }
 0x242   : > { %v7295_v7 = vpop.permute.xlu1 %3615 }
 0x243   : > { %v2655_v41 = vpop.permute.xlu0 %2654  ;;  %6216 = vmatmul.mubr.msk.f32.vlgmr.msra.gmra.mrb[30].mxu0 %vm375_vm2, %v306_v40 }
 0x244   : > { %6224 = vmatpush3.xpose.msk.msra.mxu0 %vm375_vm2, %v2655_v41  ;;  %6225 = vmatprep.mubr.msk.f32.mxu0 %vm6656_vm1, %v7928_v11 }
 0x245   : > { %6233 = vmatprep.subr.mxu0 %v7928_v11 }
 0x246   : > { %v7299_v9 = vpop.permute.xlu1 %3919 }
 0x247   : > { %v310_v42 = vpop.permute.xlu0 %309  ;;  %7934 = vst [vmem:[#allocation7_spill] sm:$0xff] %v7299_v9 }
 0x248   : > { %6226 = vmatmul.mubr.msk.f32.vlgmr.msra.gmra.mrb[32].mxu0 %vm375_vm2, %v310_v42 }
 0x249   : > { %6234 = vmatpush3.msra.mxu0 %v3160_v44  ;;  %6235 = vmatprep.mubr.msk.f32.mxu0 %vm6656_vm1, %v7928_v11 }
 0x24a   : > { %6243 = vmatprep.subr.mxu0 %v7928_v11  ;;  %v7303_v12 = vpop.permute.xlu1 %4223 }
 0x24b   : > { %v3236_v45 = vpop.permute.xlu0 %3235  ;;  %7935 = vst [vmem:[#allocation8_spill] sm:$0xff] %v7303_v12 }
 0x24c   : > { %6239 = vmatpush3.msra.mxu1 %v3236_v45 }
 0x24d   : > { %6248 = vmatprep.subr.mxu1 %v7928_v11 }
 0x24e   : > { %v7309_v15 = vpop.permute.xlu1 %4527 }
 0x24f   : > { %v7289_v3 = vpop.permute.xlu0 %3387  ;;  %7936 = vst [vmem:[#allocation9_spill] sm:$0xff] %v7309_v15 }
 0x252   : > { %v7319_v23 = vpop.permute.xlu1 %4679 }
 0x253   : > { %v7297_v8 = vpop.permute.xlu0 %3539  ;;  %7937 = vst [vmem:[#allocation10_spill] sm:$0xff] %v7319_v23 }
 0x256   : > { %v7329_v30 = vpop.permute.xlu1 %4755 }
 0x257   : > { %v7301_v10 = vpop.permute.xlu0 %3691 }
 0x25a   : > { %v7259_v46 = vpop.f32.mrb[0].mxu1  ;;  %v7339_v37 = vpop.permute.xlu1 %4907 }
 0x25b   : > { %v6077_v47 = vpop.f32.mrb[1].mxu1  ;;  %v2807_v48 = vsel %vm2806_vm3, %v7259_v46, -inf  ;;  %v7305_v13 = vpop.permute.xlu0 %3843 }
 0x25c   : > { %2808 = vmax.xlane.f32.xlu0 %v2807_v48 }
 0x25e   : > { %v7263_v49 = vpop.f32.mrb[2].mxu1  ;;  %v7349_v44 = vpop.permute.xlu1 %5059 }
 0x25f   : > { %v6082_v50 = vpop.f32.mrb[3].mxu1  ;;  %v2810_v51 = vsel %vm2806_vm3, %v7263_v49, -inf  ;;  %v7313_v18 = vpop.permute.xlu0 %3995 }
 0x260   : > { %2811 = vmax.xlane.f32.xlu1 %v2810_v51 }
 0x263   : > { %v7321_v24 = vpop.permute.xlu0 %4147 }
 0x267   : > { %v7333_v33 = vpop.permute.xlu0 %4299 }
 0x26b   : > { %v7341_v38 = vpop.permute.xlu0 %4451 }
 0x26f   : > { %v7353_v48 = vpop.permute.xlu0 %4603 }
 0x272   : > { %v7267_v52 = vpop.f32.mrb[4].mxu1 }
 0x273   : > { %v6092_v53 = vpop.f32.mrb[5].mxu1  ;;  %v2816_v58 = vsel %vm2806_vm3, %v7267_v52, -inf }
 0x28a   : > { %v7269_v55 = vpop.f32.mrb[4].mxu0 }
 0x28b   : > { %v6087_v56 = vpop.f32.mrb[5].mxu0  ;;  %v2813_v57 = vsel %vm2806_vm3, %v7269_v55, -inf }
 0x28c   : > { %2814 = vmax.xlane.f32.xlu0 %v2813_v57  ;;  %v7359_v56 = vpop.permute.xlu1 %5211  ;;  %v7361_v57 = vpop.permute.xlu0 %4831 }
 0x28d   : > { %7938 = vst [vmem:[#allocation11_spill] sm:$0xff] %v7359_v56  ;;  %7939 = vst [vmem:[#allocation12_spill] sm:$0xff] %v7361_v57 }
 0x290   : > { %2817 = vmax.xlane.f32.xlu0 %v2816_v58 }
 0x2ad   : > { %v7283_v63 = vpop.f32.mrb[6].mxu1 }
 0x2ae   : > { %v6102_v0 = vpop.f32.mrb[7].mxu1  ;;  %v2822_v1 = vsel %vm2806_vm3, %v7283_v63, -inf }
 0x2af   : > { %2823 = vmax.xlane.f32.xlu0 %v2822_v1 }
 0x2b5   : > { %v7291_v4 = vpop.f32.mrb[6].mxu0 }
 0x2b6   : > { %v6097_v5 = vpop.f32.mrb[7].mxu0  ;;  %v2819_v6 = vsel %vm2806_vm3, %v7291_v4, -inf }
 0x2b7   : > { %2820 = vmax.xlane.f32.xlu1 %v2819_v6 }
 0x2c9   : > { %v7307_v14 = vpop.f32.mrb[8].mxu1 }
 0x2ca   : > { %v6112_v16 = vpop.f32.mrb[9].mxu1  ;;  %v2828_v17 = vsel %vm2806_vm3, %v7307_v14, -inf }
 0x2cb   : > { %2829 = vmax.xlane.f32.xlu0 %v2828_v17 }
 0x2cd   : > { %v7315_v20 = vpop.f32.mrb[10].mxu1 }
 0x2ce   : > { %v6122_v21 = vpop.f32.mrb[11].mxu1  ;;  %v2834_v22 = vsel %vm2806_vm3, %v7315_v20, -inf }
 0x2cf   : > { %2835 = vmax.xlane.f32.xlu0 %v2834_v22 }
 0x2d1   : > { %v7323_v25 = vpop.f32.mrb[12].mxu1 }
 0x2d2   : > { %v6132_v26 = vpop.f32.mrb[13].mxu1  ;;  %v2840_v27 = vsel %vm2806_vm3, %v7323_v25, -inf }
 0x2d3   : > { %2841 = vmax.xlane.f32.xlu0 %v2840_v27 }
 0x2d5   : > { %v7327_v29 = vpop.f32.mrb[14].mxu1 }
 0x2d6   : > { %v6142_v31 = vpop.f32.mrb[15].mxu1  ;;  %v2846_v32 = vsel %vm2806_vm3, %v7327_v29, -inf }
 0x2d7   : > { %2847 = vmax.xlane.f32.xlu0 %v2846_v32 }
 0x2d9   : > { %v7335_v34 = vpop.f32.mrb[16].mxu1 }
 0x2da   : > { %v6152_v35 = vpop.f32.mrb[17].mxu1  ;;  %v2852_v36 = vsel %vm2806_vm3, %v7335_v34, -inf }
 0x2db   : > { %2853 = vmax.xlane.f32.xlu0 %v2852_v36  ;;  %v7380_v36 = vpop.permute.xlu0 %4983 }
 0x2dc   : > { %7940 = vst [vmem:[#allocation13_spill] sm:$0xff] %v7380_v36 }
 0x2dd   : > { %v7343_v39 = vpop.f32.mrb[18].mxu1 }
 0x2de   : > { %v6162_v40 = vpop.f32.mrb[19].mxu1  ;;  %v2858_v41 = vsel %vm2806_vm3, %v7343_v39, -inf }
 0x2df   : > { %2859 = vmax.xlane.f32.xlu0 %v2858_v41 }
 0x2e1   : > { %v7347_v42 = vpop.f32.mrb[20].mxu1 }
 0x2e2   : > { %v6172_v45 = vpop.f32.mrb[21].mxu1  ;;  %v2864_v47 = vsel %vm2806_vm3, %v7347_v42, -inf }
 0x2e3   : > { %2865 = vmax.xlane.f32.xlu0 %v2864_v47 }
 0x2e5   : > { %v7355_v50 = vpop.f32.mrb[22].mxu1 }
 0x2e6   : > { %v6182_v51 = vpop.f32.mrb[23].mxu1  ;;  %v2870_v53 = vsel %vm2806_vm3, %v7355_v50, -inf }
 0x2e7   : > { %2871 = vmax.xlane.f32.xlu0 %v2870_v53 }
 0x2e9   : > { %v7363_v58 = vpop.f32.mrb[24].mxu1  ;;  %v7365_v0 = vpop.f32.mrb[8].mxu0 }
 0x2ea   : > { %v6192_v1 = vpop.f32.mrb[25].mxu1  ;;  %v2876_v5 = vsel %vm2806_vm3, %v7363_v58, -inf  ;;  %v6107_v6 = vpop.f32.mrb[9].mxu0  ;;  %v2825_v16 = vsel %vm2806_vm3, %v7365_v0, -inf }
 0x2eb   : > { %2877 = vmax.xlane.f32.xlu0 %v2876_v5  ;;  %2826 = vmax.xlane.f32.xlu1 %v2825_v16 }
 0x2ed   : > { %v7371_v17 = vpop.f32.mrb[26].mxu1  ;;  %v2812_v21 = vpop.xlane.xlu1 %2811 }
 0x2ee   : > { %v2904_v22 = vsub.f32 %v7263_v49, %v2812_v21  ;;  %v7374_v26 = vpop.f32.mrb[10].mxu0  ;;  %v6202_v27 = vpop.f32.mrb[27].mxu1  ;;  %v2882_v31 = vsel %vm2806_vm3, %v7371_v17, -inf }
 0x2ef   : > { %v6117_v32 = vpop.f32.mrb[11].mxu0  ;;  %2883 = vmax.xlane.f32.xlu0 %v2882_v31  ;;  %v2831_v35 = vsel %vm2806_vm3, %v7374_v26, -inf  ;;  %v7398_v27 = vpop.permute.xlu0 %5135 }
 0x2f0   : > { %v2937_v40 = vmul.f32 1.442695, %v2904_v22  ;;  %2832 = vmax.xlane.f32.xlu1 %v2831_v35  ;;  %7941 = vst [vmem:[#allocation14_spill] sm:$0xff] %v7398_v27 }
 0x2f1   : > { %v7382_v41 = vpop.f32.mrb[12].mxu0  ;;  %v7384_v45 = vpop.f32.mrb[28].mxu1 }
 0x2f2   : > { %6455 = vpow2.f32 %v2937_v40  ;;  %v6127_v49 = vpop.f32.mrb[13].mxu0  ;;  %v6212_v47 = vpop.f32.mrb[29].mxu1  ;;  %v2888_v51 = vsel %vm2806_vm3, %v7384_v45, -inf  ;;  %v2837_v53 = vsel %vm2806_vm3, %v7382_v41, -inf }
 0x2f3   : > { %2889 = vmax.xlane.f32.xlu0 %v2888_v51  ;;  %v2809_v49 = vpop.xlane.xlu0 %2808 }
 0x2f4   : > { %2838 = vmax.xlane.f32.xlu1 %v2837_v53 }
 0x2f5   : > { %v7390_v1 = vpop.f32.mrb[14].mxu0  ;;  %v7392_v5 = vpop.f32.mrb[30].mxu1 }
 0x2f6   : > { %v6137_v6 = vpop.f32.mrb[15].mxu0  ;;  %v6222_v16 = vpop.f32.mrb[31].mxu1  ;;  %v2894_v21 = vsel %vm2806_vm3, %v7392_v5, -inf  ;;  %v2843_v22 = vsel %vm2806_vm3, %v7390_v1, -inf }
 0x2f7   : > { %2895 = vmax.xlane.f32.xlu0 %v2894_v21  ;;  %v2903_v16 = vsub.f32 %v7259_v46, %v2809_v49 }
 0x2f8   : > { %2844 = vmax.xlane.f32.xlu1 %v2843_v22 }
 0x2f9   : > { %v7400_v31 = vpop.f32.mrb[16].mxu0 }
 0x2fa   : > { %v6147_v32 = vpop.f32.mrb[17].mxu0  ;;  %v7402_v35 = vpop.f32.mrb[32].mxu1  ;;  %v2849_v40 = vsel %vm2806_vm3, %v7400_v31, -inf }
 0x2fb   : > { %v6232_v47 = vpop.f32.mrb[33].mxu1  ;;  %v2900_v32 = vsel %vm2806_vm3, %v7402_v35, -inf }
 0x2fc   : > { %v7406_v51 = vpop.eup %6455  ;;  %2850 = vmax.xlane.f32.xlu1 %v2849_v40  ;;  %v2935_v47 = vmul.f32 1.442695, %v2903_v16 }
 0x2fd   : > { %v7408_v53 = vpop.f32.mrb[18].mxu0  ;;  %v3002_v6 = vsel %vm2806_vm3, %v7406_v51, 0.0 }
 0x2fe   : > { %3003 = vadd.xlane.f32.xlu0 %v3002_v6  ;;  %v6157_v21 = vpop.f32.mrb[19].mxu0  ;;  %v2855_v22 = vsel %vm2806_vm3, %v7408_v53, -inf  ;;  %6457 = vpow2.f32 %v2935_v47 }
 0x300   : > { %2856 = vmax.xlane.f32.xlu1 %v2855_v22 }
 0x302   : > { %v7417_v11 = vpop.f32.mrb[20].mxu0  ;;  %2901 = vmax.xlane.f32.xlu0 %v2900_v32 }
 0x303   : > { %v6167_v40 = vpop.f32.mrb[21].mxu0  ;;  %v2861_v27 = vsel %vm2806_vm3, %v7417_v11, -inf }
 0x304   : > { %2862 = vmax.xlane.f32.xlu1 %v2861_v27 }
 0x306   : > { %v7421_v46 = vpop.f32.mrb[22].mxu0 }
 0x307   : > { %v6177_v49 = vpop.f32.mrb[23].mxu0  ;;  %v2867_v6 = vsel %vm2806_vm3, %v7421_v46, -inf }
 0x308   : > { %2868 = vmax.xlane.f32.xlu1 %v2867_v6  ;;  %v7433_v47 = vpop.eup %6457 }
 0x309   : > { %v2999_v6 = vsel %vm2806_vm3, %v7433_v47, 0.0 }
 0x30a   : > { %v7425_v21 = vpop.f32.mrb[24].mxu0 }
 0x30b   : > { %v6187_v22 = vpop.f32.mrb[25].mxu0  ;;  %v2873_v16 = vsel %vm2806_vm3, %v7425_v21, -inf }
 0x30c   : > { %2874 = vmax.xlane.f32.xlu1 %v2873_v16 }
 0x30e   : > { %v7429_v32 = vpop.f32.mrb[26].mxu0 }
 0x30f   : > { %v6197_v40 = vpop.f32.mrb[27].mxu0  ;;  %v2879_v27 = vsel %vm2806_vm3, %v7429_v32, -inf }
 0x310   : > { %2880 = vmax.xlane.f32.xlu1 %v2879_v27 }
 0x312   : > { %v7435_v49 = vpop.f32.mrb[28].mxu0 }
 0x313   : > { %v6207_v36 = vpop.f32.mrb[29].mxu0  ;;  %v2885_v16 = vsel %vm2806_vm3, %v7435_v49, -inf }
 0x314   : > { %3000 = vadd.xlane.f32.xlu1 %v2999_v6 }
 0x316   : > { %v7439_v22 = vpop.f32.mrb[30].mxu0 }
 0x317   : > { %v6217_v57 = vpop.f32.mrb[31].mxu0 }
 0x318   : > { %2886 = vmax.xlane.f32.xlu1 %v2885_v16  ;;  %5287 = vrot.lane.b32.xlu0 %v6910_v28, %s6657_s16  ;;  %v2891_v28 = vsel %vm2806_vm3, %v7439_v22, -inf }
 0x319   : > { %v2815_v40 = vpop.xlane.xlu0 %2814 }
 0x31a   : > { %v2905_v27 = vsub.f32 %v7269_v55, %v2815_v40 }
 0x31b   : > { %v7446_v23 = vpop.f32.mrb[32].mxu0 }
 0x31c   : > { %v2939_v36 = vmul.f32 1.442695, %v2905_v27  ;;  %v6227_v15 = vpop.f32.mrb[33].mxu0  ;;  %v2897_v55 = vsel %vm2806_vm3, %v7446_v23, -inf }
 0x31d   : > { %v2818_v2 = vpop.xlane.xlu0 %2817 }
 0x31e   : > { %6459 = vpow2.f32 %v2939_v36  ;;  %v2906_v6 = vsub.f32 %v7267_v52, %v2818_v2 }
 0x320   : > { %v2941_v12 = vmul.f32 1.442695, %v2906_v6 }
 0x322   : > { %6461 = vpow2.f32 %v2941_v12 }
 0x328   : > { %v7449_v57 = vpop.eup %6459 }
 0x329   : > { %v3005_v16 = vsel %vm2806_vm3, %v7449_v57, 0.0 }
 0x32a   : > { %3006 = vadd.xlane.f32.xlu1 %v3005_v16 }
 0x32c   : > { %v7457_v15 = vpop.eup %6461 }
 0x32d   : > { %v3008_v52 = vsel %vm2806_vm3, %v7457_v15, 0.0 }
 0x32e   : > { %2892 = vmax.xlane.f32.xlu1 %v2891_v28 }
 0x332   : > { %2898 = vmax.xlane.f32.xlu1 %v2897_v55 }
 0x337   : > { %3009 = vadd.xlane.f32.xlu0 %v3008_v52 }
 0x33c   : > { %v2824_v2 = vpop.xlane.xlu0 %2823 }
 0x33d   : > { %v2908_v12 = vsub.f32 %v7283_v63, %v2824_v2 }
 0x33f   : > { %v2945_v40 = vmul.f32 1.442695, %v2908_v12 }
 0x341   : > { %6463 = vpow2.f32 %v2945_v40 }
 0x343   : > { %5363 = vrot.lane.b32.xlu1 %v6878_v19, %s6657_s16 }
 0x344   : > { %v2821_v6 = vpop.xlane.xlu1 %2820 }
 0x345   : > { %v2907_v16 = vsub.f32 %v7291_v4, %v2821_v6 }
 0x347   : > { %v2943_v28 = vmul.f32 1.442695, %v2907_v16 }
 0x349   : > { %6465 = vpow2.f32 %v2943_v28 }
 0x34b   : > { %v7464_v27 = vpop.eup %6463 }
 0x34c   : > { %v3014_v36 = vsel %vm2806_vm3, %v7464_v27, 0.0 }
 0x34d   : > { %3015 = vadd.xlane.f32.xlu0 %v3014_v36 }
 0x353   : > { %v7472_v9 = vpop.eup %6465 }
 0x358   : > { %v2830_v55 = vpop.xlane.xlu0 %2829 }
 0x359   : > { %v2910_v52 = vsub.f32 %v7307_v14, %v2830_v55  ;;  %v3011_v14 = vsel %vm2806_vm3, %v7472_v9, 0.0 }
 0x35b   : > { %v2949_v63 = vmul.f32 1.442695, %v2910_v52 }
 0x35c   : > { %v2836_v2 = vpop.xlane.xlu0 %2835 }
 0x35d   : > { %6467 = vpow2.f32 %v2949_v63  ;;  %v2912_v12 = vsub.f32 %v7315_v20, %v2836_v2 }
 0x35f   : > { %v2953_v19 = vmul.f32 1.442695, %v2912_v12 }
 0x360   : > { %v2842_v40 = vpop.xlane.xlu0 %2841 }
 0x361   : > { %6469 = vpow2.f32 %v2953_v19  ;;  %v2914_v62 = vsub.f32 %v7323_v25, %v2842_v40 }
 0x363   : > { %v2957_v36 = vmul.f32 1.442695, %v2914_v62 }
 0x364   : > { %v2848_v56 = vpop.xlane.xlu0 %2847 }
 0x365   : > { %6471 = vpow2.f32 %v2957_v36  ;;  %v2916_v4 = vsub.f32 %v7327_v29, %v2848_v56 }
 0x367   : > { %v7477_v6 = vpop.eup %6467  ;;  %v2961_v16 = vmul.f32 1.442695, %v2916_v4  ;;  %3012 = vadd.xlane.f32.xlu1 %v3011_v14 }
 0x368   : > { %v2854_v20 = vpop.xlane.xlu0 %2853  ;;  %v3020_v28 = vsel %vm2806_vm3, %v7477_v6, 0.0 }
 0x369   : > { %6473 = vpow2.f32 %v2961_v16  ;;  %v2918_v25 = vsub.f32 %v7335_v34, %v2854_v20  ;;  %3021 = vadd.xlane.f32.xlu0 %v3020_v28 }
 0x36b   : > { %v7482_v62 = vpop.eup %6469  ;;  %v2965_v55 = vmul.f32 1.442695, %v2918_v25 }
 0x36c   : > { %v2860_v52 = vpop.xlane.xlu0 %2859  ;;  %v3026_v29 = vsel %vm2806_vm3, %v7482_v62, 0.0 }
 0x36d   : > { %6475 = vpow2.f32 %v2965_v55  ;;  %v2920_v56 = vsub.f32 %v7343_v39, %v2860_v52  ;;  %3027 = vadd.xlane.f32.xlu0 %v3026_v29 }
 0x36f   : > { %v7487_v63 = vpop.eup %6471  ;;  %v2969_v2 = vmul.f32 1.442695, %v2920_v56 }
 0x370   : > { %v2866_v12 = vpop.xlane.xlu0 %2865  ;;  %v3032_v19 = vsel %vm2806_vm3, %v7487_v63, 0.0 }
 0x371   : > { %6477 = vpow2.f32 %v2969_v2  ;;  %v2922_v34 = vsub.f32 %v7347_v42, %v2866_v12  ;;  %3033 = vadd.xlane.f32.xlu0 %v3032_v19 }
 0x373   : > { %v7492_v40 = vpop.eup %6473  ;;  %v2973_v36 = vmul.f32 1.442695, %v2922_v34 }
 0x374   : > { %v2872_v4 = vpop.xlane.xlu0 %2871  ;;  %v3038_v14 = vsel %vm2806_vm3, %v7492_v40, 0.0 }
 0x375   : > { %6479 = vpow2.f32 %v2973_v36  ;;  %v2924_v39 = vsub.f32 %v7355_v50, %v2872_v4  ;;  %3039 = vadd.xlane.f32.xlu0 %v3038_v14 }
 0x377   : > { %v7497_v16 = vpop.eup %6475  ;;  %v2977_v20 = vmul.f32 1.442695, %v2924_v39 }
 0x378   : > { %v2878_v28 = vpop.xlane.xlu0 %2877  ;;  %v3044_v25 = vsel %vm2806_vm3, %v7497_v16, 0.0  ;;  %v2827_v55 = vpop.xlane.xlu1 %2826 }
 0x379   : > { %6481 = vpow2.f32 %v2977_v20  ;;  %v2926_v42 = vsub.f32 %v7363_v58, %v2878_v28  ;;  %3045 = vadd.xlane.f32.xlu0 %v3044_v25  ;;  %v2909_v52 = vsub.f32 %v7365_v0, %v2827_v55 }
 0x37b   : > { %v7503_v29 = vpop.eup %6477  ;;  %v2981_v56 = vmul.f32 1.442695, %v2926_v42  ;;  %v2947_v2 = vmul.f32 1.442695, %v2909_v52 }
 0x37c   : > { %v2884_v50 = vpop.xlane.xlu0 %2883  ;;  %v3050_v12 = vsel %vm2806_vm3, %v7503_v29, 0.0 }
 0x37d   : > { %6483 = vpow2.f32 %v2981_v56  ;;  %v2928_v19 = vsub.f32 %v7371_v17, %v2884_v50  ;;  %v2833_v34 = vpop.xlane.xlu1 %2832  ;;  %3051 = vadd.xlane.f32.xlu0 %v3050_v12 }
 0x37e   : > { %6485 = vpow2.f32 %v2947_v2  ;;  %v2911_v58 = vsub.f32 %v7374_v26, %v2833_v34 }
 0x37f   : > { %v7509_v36 = vpop.eup %6479  ;;  %v2985_v4 = vmul.f32 1.442695, %v2928_v19 }
 0x380   : > { %v2951_v0 = vmul.f32 1.442695, %v2911_v58  ;;  %v2890_v14 = vpop.xlane.xlu0 %2889  ;;  %v3056_v39 = vsel %vm2806_vm3, %v7509_v36, 0.0 }
 0x381   : > { %6487 = vpow2.f32 %v2985_v4  ;;  %v2930_v20 = vsub.f32 %v7384_v45, %v2890_v14  ;;  %v2839_v28 = vpop.xlane.xlu1 %2838  ;;  %3057 = vadd.xlane.f32.xlu0 %v3056_v39 }
 0x382   : > { %6489 = vpow2.f32 %v2951_v0  ;;  %v2913_v17 = vsub.f32 %v7382_v41, %v2839_v28 }
 0x383   : > { %v7515_v25 = vpop.eup %6481  ;;  %v2989_v42 = vmul.f32 1.442695, %v2930_v20 }
 0x384   : > { %v2955_v26 = vmul.f32 1.442695, %v2913_v17  ;;  %v2896_v55 = vpop.xlane.xlu0 %2895  ;;  %v3062_v52 = vsel %vm2806_vm3, %v7515_v25, 0.0 }
 0x385   : > { %6491 = vpow2.f32 %v2989_v42  ;;  %v2932_v56 = vsub.f32 %v7392_v5, %v2896_v55  ;;  %v2845_v2 = vpop.xlane.xlu1 %2844  ;;  %3063 = vadd.xlane.f32.xlu0 %v3062_v52 }
 0x386   : > { %6493 = vpow2.f32 %v2955_v26  ;;  %v2915_v45 = vsub.f32 %v7390_v1, %v2845_v2 }
 0x387   : > { %v7521_v50 = vpop.eup %6483  ;;  %v2993_v12 = vmul.f32 1.442695, %v2932_v56 }
 0x388   : > { %v7523_v41 = vpop.eup %6485  ;;  %v2959_v19 = vmul.f32 1.442695, %v2915_v45  ;;  %v3068_v34 = vsel %vm2806_vm3, %v7521_v50, 0.0 }
 0x389   : > { %6495 = vpow2.f32 %v2993_v12  ;;  %v2851_v58 = vpop.xlane.xlu1 %2850  ;;  %3069 = vadd.xlane.f32.xlu0 %v3068_v34  ;;  %v3017_v5 = vsel %vm2806_vm3, %v7523_v41, 0.0 }
 0x38a   : > { %6497 = vpow2.f32 %v2959_v19  ;;  %v2917_v4 = vsub.f32 %v7400_v31, %v2851_v58  ;;  %3018 = vadd.xlane.f32.xlu1 %v3017_v5 }
 0x38b   : > { %v7530_v1 = vpop.eup %6487  ;;  %v3004_v0 = vpop.xlane.xlu0 %3003 }
 0x38c   : > { %v7532_v14 = vpop.eup %6489  ;;  %v2963_v39 = vmul.f32 1.442695, %v2917_v4  ;;  %6499 = vrcp.f32 %v3004_v0  ;;  %v3074_v20 = vsel %vm2806_vm3, %v7530_v1, 0.0 }
 0x38d   : > { %v2857_v28 = vpop.xlane.xlu1 %2856  ;;  %3075 = vadd.xlane.f32.xlu0 %v3074_v20  ;;  %v3023_v17 = vsel %vm2806_vm3, %v7532_v14, 0.0 }
 0x38e   : > { %6501 = vpow2.f32 %v2963_v39  ;;  %v2919_v42 = vsub.f32 %v7408_v53, %v2857_v28  ;;  %3024 = vadd.xlane.f32.xlu1 %v3023_v17 }
 0x38f   : > { %v7539_v31 = vpop.eup %6491  ;;  %v2902_v26 = vpop.xlane.xlu0 %2901 }
 0x390   : > { %v7541_v55 = vpop.eup %6493  ;;  %v2967_v52 = vmul.f32 1.442695, %v2919_v42  ;;  %v2934_v56 = vsub.f32 %v7402_v35, %v2902_v26  ;;  %v3080_v2 = vsel %vm2806_vm3, %v7539_v31, 0.0 }
 0x391   : > { %v2863_v45 = vpop.xlane.xlu1 %2862  ;;  %3081 = vadd.xlane.f32.xlu0 %v3080_v2  ;;  %v3029_v12 = vsel %vm2806_vm3, %v7541_v55, 0.0 }
 0x392   : > { %6503 = vpow2.f32 %v2967_v52  ;;  %v2997_v19 = vmul.f32 1.442695, %v2934_v56  ;;  %v2921_v53 = vsub.f32 %v7417_v11, %v2863_v45  ;;  %3030 = vadd.xlane.f32.xlu1 %v3029_v12  ;;  %v7942_v56 = vmov 0.0  }
 0x393   : > { %v7549_v34 = vpop.eup %6495 }
 0x394   : > { %v7551_v58 = vpop.eup %6497  ;;  %6505 = vpow2.f32 %v2997_v19  ;;  %v2971_v5 = vmul.f32 1.442695, %v2921_v53  ;;  %v3086_v35 = vsel %vm2806_vm3, %v7549_v34, 0.0 }
 0x395   : > { %v2869_v4 = vpop.xlane.xlu1 %2868  ;;  %3087 = vadd.xlane.f32.xlu0 %v3086_v35  ;;  %v3035_v0 = vsel %vm2806_vm3, %v7551_v58, 0.0 }
 0x396   : > { %v6500_v39 = vpop.eup %6499  ;;  %6507 = vpow2.f32 %v2971_v5  ;;  %v2923_v20 = vsub.f32 %v7421_v46, %v2869_v4  ;;  %3036 = vadd.xlane.f32.xlu1 %v3035_v0 }
 0x397   : > { %v3128_v11 = vmul.f32 %v6500_v39, %v7406_v51 }
 0x398   : > { %v7559_v28 = vpop.eup %6501  ;;  %v2975_v17 = vmul.f32 1.442695, %v2923_v20 }
 0x399   : > { %v2875_v42 = vpop.xlane.xlu1 %2874  ;;  %6241 = vmatmul.mubr.msk.f32.vlgmr.msra.gmra.mrb[34].mxu1 %vm2806_vm3, %v3128_v11  ;;  %v3041_v26 = vsel %vm2806_vm3, %v7559_v28, 0.0 }
 0x39a   : > { %6509 = vpow2.f32 %v2975_v17  ;;  %v2925_v52 = vsub.f32 %v7425_v21, %v2875_v42  ;;  %6249 = vmatpush3.msra.mxu1 %v7289_v3  ;;  %3042 = vadd.xlane.f32.xlu1 %v3041_v26 }
 0x39b   : > { %6250 = vmatprep.mubr.msk.f32.mxu1 %vm6656_vm1, %v7942_v56  ;;  %6258 = vmatprep.subr.mxu1 %v7942_v56 }
 0x39c   : > { %v7569_v51 = vpop.eup %6503  ;;  %v2979_v46 = vmul.f32 1.442695, %v2925_v52 }
 0x39d   : > { %v2881_v2 = vpop.xlane.xlu1 %2880  ;;  %v3047_v45 = vsel %vm2806_vm3, %v7569_v51, 0.0 }
 0x39e   : > { %v7573_v12 = vpop.eup %6505  ;;  %6511 = vpow2.f32 %v2979_v46  ;;  %v2927_v21 = vsub.f32 %v7429_v32, %v2881_v2  ;;  %3048 = vadd.xlane.f32.xlu1 %v3047_v45 }
 0x39f   : > { %v3092_v3 = vsel %vm2806_vm3, %v7573_v12, 0.0 }
 0x3a0   : > { %v7578_v19 = vpop.eup %6507  ;;  %v2983_v53 = vmul.f32 1.442695, %v2927_v21  ;;  %3093 = vadd.xlane.f32.xlu0 %v3092_v3 }
 0x3a1   : > { %v3001_v5 = vpop.xlane.xlu1 %3000  ;;  %v3053_v35 = vsel %vm2806_vm3, %v7578_v19, 0.0 }
 0x3a2   : > { %6513 = vpow2.f32 %v2983_v53  ;;  %3054 = vadd.xlane.f32.xlu1 %v3053_v35  ;;  %v7608_v53 = vpop.permute.xlu0 %5287 }
 0x3a3   : > { %6515 = vrcp.f32 %v3001_v5 }
 0x3a4   : > { %v7582_v4 = vpop.eup %6509 }
 0x3a5   : > { %v2887_v0 = vpop.xlane.xlu1 %2886  ;;  %v3059_v32 = vsel %vm2806_vm3, %v7582_v4, 0.0 }
 0x3a6   : > { %v2929_v39 = vsub.f32 %v7435_v49, %v2887_v0  ;;  %3060 = vadd.xlane.f32.xlu1 %v3059_v32 }
 0x3a8   : > { %v7587_v20 = vpop.eup %6511  ;;  %v2987_v11 = vmul.f32 1.442695, %v2929_v39 }
 0x3a9   : > { %v3065_v17 = vsel %vm2806_vm3, %v7587_v20, 0.0 }
 0x3aa   : > { %6517 = vpow2.f32 %v2987_v11  ;;  %3066 = vadd.xlane.f32.xlu1 %v3065_v17 }
 0x3ac   : > { %v7591_v42 = vpop.eup %6513 }
 0x3ad   : > { %v6516_v26 = vpop.eup %6515  ;;  %v3071_v52 = vsel %vm2806_vm3, %v7591_v42, 0.0 }
 0x3ae   : > { %v3127_v46 = vmul.f32 %v6516_v26, %v7433_v47  ;;  %3072 = vadd.xlane.f32.xlu1 %v3071_v52 }
 0x3b0   : > { %6236 = vmatmul.mubr.msk.f32.vlgmr.msra.gmra.mrb[34].mxu0 %vm2806_vm3, %v3127_v46 }
 0x3b1   : > { %6244 = vmatpush3.msra.mxu0 %v7275_v59  ;;  %6245 = vmatprep.mubr.msk.f32.mxu0 %vm6656_vm1, %v7942_v56 }
 0x3b2   : > { %6253 = vmatprep.subr.mxu0 %v7942_v56 }
 0x3b4   : > { %v7601_v49 = vpop.eup %6517 }
 0x3b5   : > { %v3077_v2 = vsel %vm2806_vm3, %v7601_v49, 0.0 }
 0x3b6   : > { %3078 = vadd.xlane.f32.xlu1 %v3077_v2  ;;  %5439 = vrot.lane.b32.xlu0 %v6998_v54, %s6657_s16 }
 0x3b7   : > { %v3007_v47 = vpop.xlane.xlu1 %3006 }
 0x3b8   : > { %6519 = vrcp.f32 %v3007_v47 }
 0x3bb   : > { %v2893_v45 = vpop.xlane.xlu1 %2892 }
 0x3bc   : > { %v2931_v21 = vsub.f32 %v7439_v22, %v2893_v45 }
 0x3be   : > { %v2991_v59 = vmul.f32 1.442695, %v2931_v21 }
 0x3bf   : > { %v2899_v3 = vpop.xlane.xlu1 %2898 }
 0x3c0   : > { %6521 = vpow2.f32 %v2991_v59  ;;  %v2933_v5 = vsub.f32 %v7446_v23, %v2899_v3 }
 0x3c2   : > { %v6520_v35 = vpop.eup %6519  ;;  %v2995_v0 = vmul.f32 1.442695, %v2933_v5 }
 0x3c3   : > { %v3129_v32 = vmul.f32 %v6520_v35, %v7449_v57 }
 0x3c4   : > { %6523 = vpow2.f32 %v2995_v0  ;;  %v3010_v39 = vpop.xlane.xlu0 %3009 }
 0x3c5   : > { %6525 = vrcp.f32 %v3010_v39  ;;  %6246 = vmatmul.mubr.msk.f32.vlgmr.msra.gmra.mrb[36].mxu0 %vm2806_vm3, %v3129_v32 }
 0x3c6   : > { %6254 = vmatpush3.msra.mxu0 %v7277_v60  ;;  %6255 = vmatprep.mubr.msk.f32.mxu0 %vm6656_vm1, %v7942_v56 }
 0x3c7   : > { %6263 = vmatprep.subr.mxu0 %v7942_v56 }
 0x3ca   : > { %v7617_v54 = vpop.eup %6521 }
 0x3cb   : > { %v3083_v23 = vsel %vm2806_vm3, %v7617_v54, 0.0 }
 0x3cc   : > { %3084 = vadd.xlane.f32.xlu1 %v3083_v23 }
 0x3ce   : > { %v7621_v22 = vpop.eup %6523 }
 0x3cf   : > { %v6526_v57 = vpop.eup %6525  ;;  %v3089_v11 = vsel %vm2806_vm3, %v7621_v22, 0.0 }
 0x3d0   : > { %v3130_v17 = vmul.f32 %v6526_v57, %v7457_v15  ;;  %3090 = vadd.xlane.f32.xlu1 %v3089_v11 }
 0x3d2   : > { %6251 = vmatmul.mubr.msk.f32.vlgmr.msra.gmra.mrb[36].mxu1 %vm2806_vm3, %v3130_v17 }
 0x3d3   : > { %6259 = vmatpush3.msra.mxu1 %v7297_v8  ;;  %6260 = vmatprep.mubr.msk.f32.mxu1 %vm6656_vm1, %v7942_v56  ;;  %v7639_v8 = vpop.permute.xlu1 %5363 }
 0x3d4   : > { %6268 = vmatprep.subr.mxu1 %v7942_v56 }
 0x3da   : > { %v3016_v60 = vpop.xlane.xlu0 %3015 }
 0x3db   : > { %6527 = vrcp.f32 %v3016_v60 }
 0x3e1   : > { %5515 = vrot.lane.b32.xlu1 %v6964_v43, %s6657_s16  ;;  %s6589_s16 = scalar_lea.vmem %s6588_s14, 1024 }
 0x3e2   : > { %p6591_p1 = scmp.lt.s32.totalorder %s6589_s16, %s6583_s7 }
 0x3e4   : > { %p6592_p2 = por %p6591_p1, %p6590_p0 }
 0x3e5   : > { %v6528_v26 = vpop.eup %6527 }
 0x3e6   : > { %v3132_v52 = vmul.f32 %v6528_v26, %v7464_v27  ;;  %p6593_p3 = pnand %p6592_p2, %p6586_p13 }
 0x3e8   : > { %6261 = vmatmul.mubr.msk.f32.vlgmr.msra.gmra.mrb[38].mxu1 %vm2806_vm3, %v3132_v52 }
 0x3e9   : > { %6269 = vmatpush3.msra.mxu1 %v7301_v10  ;;  %6270 = vmatprep.mubr.msk.f32.mxu1 %vm6656_vm1, %v7942_v56 }
 0x3ea   : > { %6278 = vmatprep.subr.mxu1 %v7942_v56 }
 0x3f4   : > { %v3013_v15 = vpop.xlane.xlu1 %3012 }
 0x3f5   : > { %6529 = vrcp.f32 %v3013_v15 }
 0x3f6   : > { %v3022_v46 = vpop.xlane.xlu0 %3021 }
 0x3f7   : > { %6531 = vrcp.f32 %v3022_v46 }
 0x3fa   : > { %v3028_v2 = vpop.xlane.xlu0 %3027 }
 0x3fb   : > { %6533 = vrcp.f32 %v3028_v2 }
 0x3fe   : > { %v3034_v43 = vpop.xlane.xlu0 %3033 }
 0x3ff   : > { %v6530_v47 = vpop.eup %6529  ;;  %6535 = vrcp.f32 %v3034_v43 }
 0x400   : > { %v3131_v27 = vmul.f32 %v6530_v47, %v7472_v9 }
 0x401   : > { %v6532_v45 = vpop.eup %6531 }
 0x402   : > { %v3134_v10 = vmul.f32 %v6532_v45, %v7477_v6  ;;  %v3040_v21 = vpop.xlane.xlu0 %3039  ;;  %6256 = vmatmul.mubr.msk.f32.vlgmr.msra.gmra.mrb[38].mxu0 %vm2806_vm3, %v3131_v27 }
 0x403   : > { %6537 = vrcp.f32 %v3040_v21  ;;  %6264 = vmatpush3.msra.mxu0 %v7295_v7  ;;  %6265 = vmatprep.mubr.msk.f32.mxu0 %vm6656_vm1, %v7942_v56 }
 0x404   : > { %6271 = vmatmul.mubr.msk.f32.vlgmr.msra.gmra.mrb[40].mxu1 %vm2806_vm3, %v3134_v10  ;;  %6273 = vmatprep.subr.mxu0 %v7942_v56 }
 0x405   : > { %v6534_v59 = vpop.eup %6533  ;;  %6279 = vmatpush3.msra.mxu1 %v7305_v13  ;;  %6280 = vmatprep.mubr.msk.f32.mxu1 %vm6656_vm1, %v7942_v56 }
 0x406   : > { %v3136_v9 = vmul.f32 %v6534_v59, %v7482_v62  ;;  %v3046_v6 = vpop.xlane.xlu0 %3045  ;;  %6288 = vmatprep.subr.mxu1 %v7942_v56 }
 0x407   : > { %6539 = vrcp.f32 %v3046_v6 }
 0x408   : > { %6281 = vmatmul.mubr.msk.f32.vlgmr.msra.gmra.mrb[42].mxu1 %vm2806_vm3, %v3136_v9  ;;  %v7947_v9 = vld [vmem:[#allocation6_spill] sm:$0xff] }
 0x409   : > { %v6536_v7 = vpop.eup %6535  ;;  %6289 = vmatpush3.msra.mxu1 %v7313_v18  ;;  %6290 = vmatprep.mubr.msk.f32.mxu1 %vm6656_vm1, %v7942_v56 }
 0x40a   : > { %v3138_v3 = vmul.f32 %v6536_v7, %v7487_v63  ;;  %v3052_v13 = vpop.xlane.xlu0 %3051  ;;  %6298 = vmatprep.subr.mxu1 %v7942_v56 }
 0x40b   : > { %6541 = vrcp.f32 %v3052_v13 }
 0x40c   : > { %6291 = vmatmul.mubr.msk.f32.vlgmr.msra.gmra.mrb[44].mxu1 %vm2806_vm3, %v3138_v3  ;;  %v7948_v3 = vld [vmem:[#allocation9_spill] sm:$0xff] }
 0x40d   : > { %v6538_v62 = vpop.eup %6537  ;;  %6299 = vmatpush3.msra.mxu1 %v7321_v24  ;;  %6300 = vmatprep.mubr.msk.f32.mxu1 %vm6656_vm1, %v7942_v56 }
 0x40e   : > { %v3140_v5 = vmul.f32 %v6538_v62, %v7492_v40  ;;  %v3058_v18 = vpop.xlane.xlu0 %3057  ;;  %6308 = vmatprep.subr.mxu1 %v7942_v56 }
 0x40f   : > { %6543 = vrcp.f32 %v3058_v18 }
 0x410   : > { %6301 = vmatmul.mubr.msk.f32.vlgmr.msra.gmra.mrb[46].mxu1 %vm2806_vm3, %v3140_v5  ;;  %v7949_v5 = vld [vmem:[#allocation10_spill] sm:$0xff] }
 0x411   : > { %v6540_v63 = vpop.eup %6539  ;;  %6309 = vmatpush3.msra.mxu1 %v7333_v33  ;;  %6310 = vmatprep.mubr.msk.f32.mxu1 %vm6656_vm1, %v7942_v56 }
 0x412   : > { %v3142_v35 = vmul.f32 %v6540_v63, %v7497_v16  ;;  %v3064_v24 = vpop.xlane.xlu0 %3063  ;;  %6318 = vmatprep.subr.mxu1 %v7942_v56 }
 0x413   : > { %6545 = vrcp.f32 %v3064_v24 }
 0x414   : > { %6311 = vmatmul.mubr.msk.f32.vlgmr.msra.gmra.mrb[48].mxu1 %vm2806_vm3, %v3142_v35 }
 0x415   : > { %v6542_v40 = vpop.eup %6541  ;;  %6319 = vmatpush3.msra.mxu1 %v7341_v38  ;;  %6320 = vmatprep.mubr.msk.f32.mxu1 %vm6656_vm1, %v7942_v56 }
 0x416   : > { %v3144_v0 = vmul.f32 %v6542_v40, %v7503_v29  ;;  %v3070_v33 = vpop.xlane.xlu0 %3069  ;;  %6328 = vmatprep.subr.mxu1 %v7942_v56 }
 0x417   : > { %6547 = vrcp.f32 %v3070_v33  ;;  %v3019_v32 = vpop.xlane.xlu1 %3018  ;;  %v7952_v33 = vld [vmem:[#allocation14_spill] sm:$0xff] }
 0x418   : > { %6549 = vrcp.f32 %v3019_v32  ;;  %6321 = vmatmul.mubr.msk.f32.vlgmr.msra.gmra.mrb[50].mxu1 %vm2806_vm3, %v3144_v0 }
 0x419   : > { %v6544_v16 = vpop.eup %6543  ;;  %6329 = vmatpush3.msra.mxu1 %v7353_v48  ;;  %6330 = vmatprep.mubr.msk.f32.mxu1 %vm6656_vm1, %v7942_v56 }
 0x41a   : > { %v3146_v38 = vmul.f32 %v6544_v16, %v7509_v36  ;;  %v3076_v39 = vpop.xlane.xlu0 %3075  ;;  %6338 = vmatprep.subr.mxu1 %v7942_v56 }
 0x41b   : > { %6551 = vrcp.f32 %v3076_v39  ;;  %v3025_v29 = vpop.xlane.xlu1 %3024 }
 0x41c   : > { %6553 = vrcp.f32 %v3025_v29  ;;  %6331 = vmatmul.mubr.msk.f32.vlgmr.msra.gmra.mrb[52].mxu1 %vm2806_vm3, %v3146_v38 }
 0x41d   : > { %v6546_v23 = vpop.eup %6545  ;;  %6339 = vmatpush3.msra.mxu1 %v7329_v30  ;;  %6340 = vmatprep.mubr.msk.f32.mxu1 %vm6656_vm1, %v7942_v56 }
 0x41e   : > { %v3148_v48 = vmul.f32 %v6546_v23, %v7515_v25  ;;  %v3082_v57 = vpop.xlane.xlu0 %3081  ;;  %6348 = vmatprep.subr.mxu1 %v7942_v56 }
 0x41f   : > { %6555 = vrcp.f32 %v3082_v57  ;;  %v3031_v36 = vpop.xlane.xlu1 %3030 }
 0x420   : > { %6557 = vrcp.f32 %v3031_v36  ;;  %6341 = vmatmul.mubr.msk.f32.vlgmr.msra.gmra.mrb[54].mxu1 %vm2806_vm3, %v3148_v48 }
 0x421   : > { %v6548_v11 = vpop.eup %6547  ;;  %6349 = vmatpush3.msra.mxu1 %v7339_v37  ;;  %6350 = vmatprep.mubr.msk.f32.mxu1 %vm6656_vm1, %v7942_v56 }
 0x422   : > { %v6550_v30 = vpop.eup %6549  ;;  %v3150_v17 = vmul.f32 %v6548_v11, %v7521_v50  ;;  %v3088_v60 = vpop.xlane.xlu0 %3087  ;;  %6358 = vmatprep.subr.mxu1 %v7942_v56 }
 0x423   : > { %v3133_v25 = vmul.f32 %v6550_v30, %v7523_v41  ;;  %6559 = vrcp.f32 %v3088_v60  ;;  %v3037_v26 = vpop.xlane.xlu1 %3036 }
 0x424   : > { %6561 = vrcp.f32 %v3037_v26  ;;  %6351 = vmatmul.mubr.msk.f32.vlgmr.msra.gmra.mrb[56].mxu1 %vm2806_vm3, %v3150_v17 }
 0x425   : > { %v6552_v52 = vpop.eup %6551  ;;  %6266 = vmatmul.mubr.msk.f32.vlgmr.msra.gmra.mrb[40].mxu0 %vm2806_vm3, %v3133_v25  ;;  %6359 = vmatpush3.msra.mxu1 %v7349_v44 }
 0x426   : > { %v6554_v37 = vpop.eup %6553  ;;  %v3152_v15 = vmul.f32 %v6552_v52, %v7530_v1  ;;  %6274 = vmatpush3.msra.mxu0 %v7279_v61  ;;  %6275 = vmatprep.mubr.msk.f32.mxu0 %vm6656_vm1, %v7942_v56  ;;  %v7943_v61 = vld [vmem:[#allocation11_spill] sm:$0xff] }
 0x427   : > { %v3135_v50 = vmul.f32 %v6554_v37, %v7532_v14  ;;  %v3043_v41 = vpop.xlane.xlu1 %3042  ;;  %6283 = vmatprep.subr.mxu0 %v7942_v56  ;;  %6360 = vmatprep.mubr.msk.f32.mxu1 %vm6656_vm1, %v7942_v56  ;;  %v7944_v14 = vld [vmem:[#allocation7_spill] sm:$0xff] }
 0x428   : > { %6563 = vrcp.f32 %v3043_v41  ;;  %6368 = vmatprep.subr.mxu1 %v7942_v56  ;;  %6361 = vmatmul.mubr.msk.f32.vlgmr.msra.gmra.mrb[58].mxu1 %vm2806_vm3, %v3152_v15 }
 0x429   : > { %v6556_v44 = vpop.eup %6555  ;;  %6276 = vmatmul.mubr.msk.f32.vlgmr.msra.gmra.mrb[42].mxu0 %vm2806_vm3, %v3135_v50  ;;  %6369 = vmatpush3.msra.mxu1 %v7943_v61 }
 0x42a   : > { %v6558_v1 = vpop.eup %6557  ;;  %v3154_v46 = vmul.f32 %v6556_v44, %v7539_v31  ;;  %6284 = vmatpush3.msra.mxu0 %v7944_v14  ;;  %6285 = vmatprep.mubr.msk.f32.mxu0 %vm6656_vm1, %v7942_v56 }
 0x42b   : > { %v3137_v2 = vmul.f32 %v6558_v1, %v7541_v55  ;;  %v3049_v43 = vpop.xlane.xlu1 %3048  ;;  %6293 = vmatprep.subr.mxu0 %v7942_v56  ;;  %6370 = vmatprep.mubr.msk.f32.mxu1 %vm6656_vm1, %v7942_v56  ;;  %v7945_v55 = vld [vmem:[#allocation5_spill] sm:$0xff] }
 0x42c   : > { %6565 = vrcp.f32 %v3049_v43  ;;  %6378 = vmatprep.subr.mxu1 %v7942_v56  ;;  %6371 = vmatmul.mubr.msk.f32.vlgmr.msra.gmra.mrb[60].mxu1 %vm2806_vm3, %v3154_v46 }
 0x42d   : > { %v6560_v47 = vpop.eup %6559  ;;  %6286 = vmatmul.mubr.msk.f32.vlgmr.msra.gmra.mrb[44].mxu0 %vm2806_vm3, %v3137_v2  ;;  %6379 = vmatpush3.msra.mxu1 %v7639_v8  ;;  %v7946_v8 = vld [vmem:[#allocation8_spill] sm:$0xff]  ;;  %v3094_v16 = vpop.xlane.xlu0 %3093 }
 0x42e   : > { %v6562_v31 = vpop.eup %6561  ;;  %v3156_v27 = vmul.f32 %v6560_v47, %v7549_v34  ;;  %6294 = vmatpush3.msra.mxu0 %v7945_v55  ;;  %6295 = vmatprep.mubr.msk.f32.mxu0 %vm6656_vm1, %v7942_v56 }
 0x42f   : > { %v3139_v45 = vmul.f32 %v6562_v31, %v7551_v58  ;;  %v3055_v10 = vpop.xlane.xlu1 %3054  ;;  %6303 = vmatprep.subr.mxu0 %v7942_v56  ;;  %6380 = vmatprep.mubr.msk.f32.mxu1 %vm6656_vm1, %v7942_v56 }
 0x430   : > { %6567 = vrcp.f32 %v3055_v10  ;;  %6381 = vmatmul.mubr.msk.f32.vlgmr.msra.gmra.mrb[62].mxu1 %vm2806_vm3, %v3156_v27  ;;  %6388 = vmatprep.subr.mxu1 %v7942_v56 }
 0x431   : > { %6296 = vmatmul.mubr.msk.f32.vlgmr.msra.gmra.mrb[46].mxu0 %vm2806_vm3, %v3139_v45  ;;  %6390 = vmatprep.mubr.msk.f32.mxu1 %vm6656_vm1, %v7942_v56  ;;  %v5440_v48 = vpop.permute.xlu0 %5439 }
 0x432   : > { %v6564_v34 = vpop.eup %6563  ;;  %6304 = vmatpush3.msra.mxu0 %v7946_v8  ;;  %6305 = vmatprep.mubr.msk.f32.mxu0 %vm6656_vm1, %v7942_v56 }
 0x433   : > { %v3141_v58 = vmul.f32 %v6564_v34, %v7559_v28  ;;  %v3061_v21 = vpop.xlane.xlu1 %3060  ;;  %6313 = vmatprep.subr.mxu0 %v7942_v56 }
 0x434   : > { %6569 = vrcp.f32 %v3061_v21 }
 0x435   : > { %6306 = vmatmul.mubr.msk.f32.vlgmr.msra.gmra.mrb[48].mxu0 %vm2806_vm3, %v3141_v58 }
 0x436   : > { %v6566_v59 = vpop.eup %6565  ;;  %6314 = vmatpush3.msra.mxu0 %v7947_v9  ;;  %6315 = vmatprep.mubr.msk.f32.mxu0 %vm6656_vm1, %v7942_v56 }
 0x437   : > { %v3143_v6 = vmul.f32 %v6566_v59, %v7569_v51  ;;  %v3067_v7 = vpop.xlane.xlu1 %3066  ;;  %6323 = vmatprep.subr.mxu0 %v7942_v56 }
 0x438   : > { %6571 = vrcp.f32 %v3067_v7 }
 0x439   : > { %6316 = vmatmul.mubr.msk.f32.vlgmr.msra.gmra.mrb[50].mxu0 %vm2806_vm3, %v3143_v6 }
 0x43a   : > { %v6568_v28 = vpop.eup %6567  ;;  %6324 = vmatpush3.msra.mxu0 %v7948_v3  ;;  %6325 = vmatprep.mubr.msk.f32.mxu0 %vm6656_vm1, %v7942_v56 }
 0x43b   : > { %v3145_v13 = vmul.f32 %v6568_v28, %v7578_v19  ;;  %v3073_v62 = vpop.xlane.xlu1 %3072  ;;  %6333 = vmatprep.subr.mxu0 %v7942_v56  ;;  %v7950_v19 = vld [vmem:[#allocation12_spill] sm:$0xff] }
 0x43c   : > { %6573 = vrcp.f32 %v3073_v62 }
 0x43d   : > { %6326 = vmatmul.mubr.msk.f32.vlgmr.msra.gmra.mrb[52].mxu0 %vm2806_vm3, %v3145_v13 }
 0x43e   : > { %v6570_v51 = vpop.eup %6569  ;;  %6334 = vmatpush3.msra.mxu0 %v7949_v5  ;;  %6335 = vmatprep.mubr.msk.f32.mxu0 %vm6656_vm1, %v7942_v56 }
 0x43f   : > { %v3147_v18 = vmul.f32 %v6570_v51, %v7582_v4  ;;  %6343 = vmatprep.subr.mxu0 %v7942_v56  ;;  %v7951_v4 = vld [vmem:[#allocation13_spill] sm:$0xff] }
 0x441   : > { %6336 = vmatmul.mubr.msk.f32.vlgmr.msra.gmra.mrb[54].mxu0 %vm2806_vm3, %v3147_v18 }
 0x442   : > { %v6572_v63 = vpop.eup %6571  ;;  %6344 = vmatpush3.msra.mxu0 %v7950_v19  ;;  %6345 = vmatprep.mubr.msk.f32.mxu0 %vm6656_vm1, %v7942_v56 }
 0x443   : > { %v3149_v35 = vmul.f32 %v6572_v63, %v7587_v20  ;;  %v3079_v24 = vpop.xlane.xlu1 %3078  ;;  %6353 = vmatprep.subr.mxu0 %v7942_v56 }
 0x444   : > { %6575 = vrcp.f32 %v3079_v24 }
 0x445   : > { %6346 = vmatmul.mubr.msk.f32.vlgmr.msra.gmra.mrb[56].mxu0 %vm2806_vm3, %v3149_v35  ;;  %6577 = vrcp.f32 %v3094_v16 }
 0x446   : > { %v6574_v40 = vpop.eup %6573  ;;  %6354 = vmatpush3.msra.mxu0 %v7951_v4  ;;  %6355 = vmatprep.mubr.msk.f32.mxu0 %vm6656_vm1, %v7942_v56 }
 0x447   : > { %v3151_v0 = vmul.f32 %v6574_v40, %v7591_v42  ;;  %6363 = vmatprep.subr.mxu0 %v7942_v56 }
 0x449   : > { %6356 = vmatmul.mubr.msk.f32.vlgmr.msra.gmra.mrb[58].mxu0 %vm2806_vm3, %v3151_v0 }
 0x44a   : > { %6364 = vmatpush3.msra.mxu0 %v7952_v33  ;;  %6365 = vmatprep.mubr.msk.f32.mxu0 %vm6656_vm1, %v7942_v56 }
 0x44b   : > { %6373 = vmatprep.subr.mxu0 %v7942_v56 }
 0x44e   : > { %v6576_v20 = vpop.eup %6575 }
 0x44f   : > { %v3153_v32 = vmul.f32 %v6576_v20, %v7601_v49  ;;  %v6578_v39 = vpop.eup %6577 }
 0x450   : > { %v3158_v29 = vmul.f32 %v6578_v39, %v7573_v12 }
 0x451   : > { %6366 = vmatmul.mubr.msk.f32.vlgmr.msra.gmra.mrb[60].mxu0 %vm2806_vm3, %v3153_v32 }
 0x452   : > { %6374 = vmatpush3.msra.mxu0 %v7608_v53  ;;  %6375 = vmatprep.mubr.msk.f32.mxu0 %vm6656_vm1, %v7942_v56 }
 0x453   : > { %6383 = vmatprep.subr.mxu0 %v7942_v56 }
 0x459   : > { %v3085_v42 = vpop.xlane.xlu1 %3084 }
 0x45a   : > { %6579 = vrcp.f32 %v3085_v42 }
 0x45d   : > { %v3091_v38 = vpop.xlane.xlu1 %3090 }
 0x45e   : > { %6581 = vrcp.f32 %v3091_v38 }
 0x461   : > { %v5516_v23 = vpop.permute.xlu1 %5515 }
 0x462   : > { %6389 = vmatpush3.msra.mxu1 %v5516_v23 }
 0x463   : > { %6391 = vmatmul.mubr.msk.f32.vlgmr.msra.gmra.mrb[64].mxu1 %vm2806_vm3, %v3158_v29 }
 0x464   : > { %v6580_v49 = vpop.eup %6579 }
 0x465   : > { %v3155_v53 = vmul.f32 %v6580_v49, %v7617_v54 }
 0x467   : > { %6376 = vmatmul.mubr.msk.f32.vlgmr.msra.gmra.mrb[62].mxu0 %vm2806_vm3, %v3155_v53 }
 0x468   : > { %v6582_v57 = vpop.eup %6581  ;;  %6384 = vmatpush3.msra.mxu0 %v5440_v48  ;;  %6385 = vmatprep.mubr.msk.f32.mxu0 %vm6656_vm1, %v7942_v56 }
 0x469   : > { %v3157_v36 = vmul.f32 %v6582_v57, %v7621_v22 }
 0x46b   : > { %6386 = vmatmul.mubr.msk.f32.vlgmr.msra.gmra.mrb[64].mxu0 %vm2806_vm3, %v3157_v36 }
 0x46c   : > { %v7791_v12 = vpop.f32.mrb[34].mxu1 }
 0x46d   : > { %v6242_v11 = vpop.f32.mrb[35].mxu1 }
 0x483   : > { %v7793_v30 = vpop.f32.mrb[34].mxu0 }
 0x484   : > { %v6237_v17 = vpop.f32.mrb[35].mxu0 }
 0x498   : > { %v7795_v60 = vpop.f32.mrb[36].mxu0 }
 0x499   : > { %v6247_v54 = vpop.f32.mrb[37].mxu0 }
 0x4a5   : > { %v7797_v25 = vpop.f32.mrb[36].mxu1 }
 0x4a6   : > { %v6252_v26 = vpop.f32.mrb[37].mxu1 }
 0x4bb   : > { %v3611_v52 = vpop.f32.mrb[38].mxu1 }
 0x4bc   : > { %v6262_v37 = vpop.f32.mrb[39].mxu1  ;;  %5597 = vrot.lane.b32.xlu1 %v3611_v52, %s6658_s17 }
 0x4d5   : > { %v3535_v56 = vpop.f32.mrb[38].mxu0 }
 0x4d6   : > { %5595 = vrot.lane.b32.xlu0 %v3535_v56, %s6658_s17  ;;  %v6257_v22 = vpop.f32.mrb[39].mxu0 }
 0x4d7   : > { %v3763_v15 = vpop.f32.mrb[40].mxu1 }
 0x4d8   : > { %v6272_v50 = vpop.f32.mrb[41].mxu1  ;;  %5601 = vrot.lane.b32.xlu1 %v3763_v15, %s6658_s17 }
 0x4db   : > { %v3915_v41 = vpop.f32.mrb[42].mxu1 }
 0x4dc   : > { %v6282_v44 = vpop.f32.mrb[43].mxu1  ;;  %5613 = vrot.lane.b32.xlu1 %v3915_v41, %s6659_s21 }
 0x4df   : > { %v4067_v61 = vpop.f32.mrb[44].mxu1 }
 0x4e0   : > { %v6292_v1 = vpop.f32.mrb[45].mxu1  ;;  %5617 = vrot.lane.b32.xlu1 %v4067_v61, %s6659_s21 }
 0x4e3   : > { %v4219_v46 = vpop.f32.mrb[46].mxu1 }
 0x4e4   : > { %v6302_v14 = vpop.f32.mrb[47].mxu1  ;;  %5629 = vrot.lane.b32.xlu1 %v4219_v46, %s6660_s22 }
 0x4e7   : > { %v4371_v2 = vpop.f32.mrb[48].mxu1 }
 0x4e8   : > { %v6312_v43 = vpop.f32.mrb[49].mxu1  ;;  %5633 = vrot.lane.b32.xlu1 %v4371_v2, %s6660_s22 }
 0x4eb   : > { %v4523_v47 = vpop.f32.mrb[50].mxu1 }
 0x4ec   : > { %v6322_v31 = vpop.f32.mrb[51].mxu1  ;;  %5645 = vrot.lane.b32.xlu1 %v4523_v47, %s6661_s23 }
 0x4ef   : > { %v4675_v27 = vpop.f32.mrb[52].mxu1 }
 0x4f0   : > { %v6332_v55 = vpop.f32.mrb[53].mxu1  ;;  %5649 = vrot.lane.b32.xlu1 %v4675_v27, %s6661_s23 }
 0x4f3   : > { %v4827_v45 = vpop.f32.mrb[54].mxu1 }
 0x4f4   : > { %v6342_v10 = vpop.f32.mrb[55].mxu1  ;;  %5661 = vrot.lane.b32.xlu1 %v4827_v45, %s6662_s24 }
 0x4f7   : > { %v4979_v34 = vpop.f32.mrb[56].mxu1 }
 0x4f8   : > { %v3687_v8 = vpop.f32.mrb[40].mxu0  ;;  %v6352_v58 = vpop.f32.mrb[57].mxu1  ;;  %5665 = vrot.lane.b32.xlu1 %v4979_v34, %s6662_s24 }
 0x4f9   : > { %5599 = vrot.lane.b32.xlu0 %v3687_v8, %s6658_s17  ;;  %v6267_v21 = vpop.f32.mrb[41].mxu0 }
 0x4fb   : > { %v5131_v59 = vpop.f32.mrb[58].mxu1 }
 0x4fc   : > { %v3839_v9 = vpop.f32.mrb[42].mxu0  ;;  %v6362_v6 = vpop.f32.mrb[59].mxu1  ;;  %5677 = vrot.lane.b32.xlu1 %v5131_v59, %s6663_s25 }
 0x4fd   : > { %5611 = vrot.lane.b32.xlu0 %v3839_v9, %s6659_s21  ;;  %v6277_v7 = vpop.f32.mrb[43].mxu0 }
 0x4ff   : > { %v5283_v28 = vpop.f32.mrb[60].mxu1 }
 0x500   : > { %v3991_v3 = vpop.f32.mrb[44].mxu0  ;;  %v6372_v13 = vpop.f32.mrb[61].mxu1  ;;  %5681 = vrot.lane.b32.xlu1 %v5283_v28, %s6663_s25 }
 0x501   : > { %5615 = vrot.lane.b32.xlu0 %v3991_v3, %s6659_s21  ;;  %v6287_v62 = vpop.f32.mrb[45].mxu0 }
 0x503   : > { %v5435_v51 = vpop.f32.mrb[62].mxu1 }
 0x504   : > { %v4143_v5 = vpop.f32.mrb[46].mxu0  ;;  %5693 = vrot.lane.b32.xlu1 %v5435_v51, %s6664_s26  ;;  %v6382_v18 = vpop.f32.mrb[63].mxu1 }
 0x505   : > { %5627 = vrot.lane.b32.xlu0 %v4143_v5, %s6660_s22  ;;  %v6297_v63 = vpop.f32.mrb[47].mxu0 }
 0x508   : > { %v4295_v19 = vpop.f32.mrb[48].mxu0 }
 0x509   : > { %5631 = vrot.lane.b32.xlu0 %v4295_v19, %s6660_s22  ;;  %v6307_v35 = vpop.f32.mrb[49].mxu0 }
 0x50c   : > { %v4447_v24 = vpop.f32.mrb[50].mxu0 }
 0x50d   : > { %5643 = vrot.lane.b32.xlu0 %v4447_v24, %s6661_s23  ;;  %v6317_v40 = vpop.f32.mrb[51].mxu0 }
 0x510   : > { %v4599_v4 = vpop.f32.mrb[52].mxu0 }
 0x511   : > { %5647 = vrot.lane.b32.xlu0 %v4599_v4, %s6661_s23  ;;  %v6327_v0 = vpop.f32.mrb[53].mxu0 }
 0x514   : > { %v4751_v33 = vpop.f32.mrb[54].mxu0 }
 0x515   : > { %5659 = vrot.lane.b32.xlu0 %v4751_v33, %s6662_s24  ;;  %v6337_v20 = vpop.f32.mrb[55].mxu0 }
 0x518   : > { %v4903_v32 = vpop.f32.mrb[56].mxu0 }
 0x519   : > { %5663 = vrot.lane.b32.xlu0 %v4903_v32, %s6662_s24  ;;  %v6347_v16 = vpop.f32.mrb[57].mxu0 }
 0x51c   : > { %v5055_v42 = vpop.f32.mrb[58].mxu0 }
 0x51d   : > { %5675 = vrot.lane.b32.xlu0 %v5055_v42, %s6663_s25  ;;  %v6357_v38 = vpop.f32.mrb[59].mxu0 }
 0x524   : > { %v5207_v39 = vpop.f32.mrb[60].mxu0 }
 0x525   : > { %5679 = vrot.lane.b32.xlu0 %v5207_v39, %s6663_s25  ;;  %v6367_v29 = vpop.f32.mrb[61].mxu0 }
 0x52e   : > { %v5598_v11 = vpop.permute.xlu1 %5597 }
 0x52f   : > { %v5704_v2 = vsel %vm375_vm2, %v7791_v12, %v5598_v11 }
 0x536   : > { %v5587_v23 = vpop.f32.mrb[64].mxu1 }
 0x537   : > { %5697 = vrot.lane.b32.xlu1 %v5587_v23, %s6664_s26  ;;  %v6392_v49 = vpop.f32.mrb[65].mxu1 }
 0x53a   : > { %v5359_v53 = vpop.f32.mrb[62].mxu0 }
 0x53b   : > { %5691 = vrot.lane.b32.xlu0 %v5359_v53, %s6664_s26  ;;  %v6377_v48 = vpop.f32.mrb[63].mxu0 }
 0x53e   : > { %v5511_v57 = vpop.f32.mrb[64].mxu0 }
 0x53f   : > { %5695 = vrot.lane.b32.xlu0 %v5511_v57, %s6664_s26  ;;  %v6387_v36 = vpop.f32.mrb[65].mxu0 }
 0x548   : > { %v5596_v46 = vpop.permute.xlu0 %5595 }
 0x549   : > { %v5703_v3 = vsel %vm375_vm2, %v7793_v30, %v5596_v46 }
 0x54a   : > { %v5602_v17 = vpop.permute.xlu1 %5601 }
 0x54b   : > { %v5706_v54 = vsel %vm375_vm2, %v7797_v25, %v5602_v17 }
 0x54e   : > { %v5614_v26 = vpop.permute.xlu1 %5613 }
 0x54f   : > { %v5708_v43 = vsel %vm2806_vm3, %v5704_v2, %v5614_v26 }
 0x552   : > { %v5618_v52 = vpop.permute.xlu1 %5617 }
 0x553   : > { %v5710_v37 = vsel %vm2806_vm3, %v5706_v54, %v5618_v52 }
 0x556   : > { %v5630_v56 = vpop.permute.xlu1 %5629 }
 0x557   : > { %v5713_v31 = vsel %vm5711_vm4, %v5708_v43, %v5630_v56 }
 0x55a   : > { %v5634_v22 = vpop.permute.xlu1 %5633 }
 0x55b   : > { %v5715_v15 = vsel %vm5711_vm4, %v5710_v37, %v5634_v22 }
 0x55e   : > { %v5646_v50 = vpop.permute.xlu1 %5645 }
 0x55f   : > { %v5717_v27 = vsel %vm151_vm0, %v5713_v31, %v5646_v50 }
 0x562   : > { %v5650_v41 = vpop.permute.xlu1 %5649 }
 0x563   : > { %v5719_v44 = vsel %vm151_vm0, %v5715_v15, %v5650_v41 }
 0x566   : > { %v5662_v61 = vpop.permute.xlu1 %5661 }
 0x567   : > { %v5722_v55 = vsel %vm5720_vm5, %v5717_v27, %v5662_v61 }
 0x56a   : > { %v5666_v1 = vpop.permute.xlu1 %5665 }
 0x56b   : > { %v5600_v25 = vpop.permute.xlu0 %5599  ;;  %v5724_v13 = vsel %vm5720_vm5, %v5719_v44, %v5666_v1 }
 0x56c   : > { %v5705_v30 = vsel %vm375_vm2, %v7795_v60, %v5600_v25 }
 0x56e   : > { %v5678_v14 = vpop.permute.xlu1 %5677 }
 0x56f   : > { %v5612_v45 = vpop.permute.xlu0 %5611  ;;  %v5727_v10 = vsel %vm5725_vm6, %v5722_v55, %v5678_v14 }
 0x570   : > { %v5707_v62 = vsel %vm2806_vm3, %v5703_v3, %v5612_v45 }
 0x572   : > { %v5682_v47 = vpop.permute.xlu1 %5681 }
 0x573   : > { %v5616_v8 = vpop.permute.xlu0 %5615  ;;  %v5729_v51 = vsel %vm5725_vm6, %v5724_v13, %v5682_v47 }
 0x574   : > { %v5709_v40 = vsel %vm2806_vm3, %v5705_v30, %v5616_v8 }
 0x576   : > { %v5694_v34 = vpop.permute.xlu1 %5693 }
 0x577   : > { %v5732_v12 = vsel %vm5730_vm7, %v5727_v10, %v5694_v34  ;;  %v5628_v58 = vpop.permute.xlu0 %5627 }
 0x578   : > { %5737 = vst.msk [vmem:[%s7843_s29 + $0x8] sm:$0xff] %vm5735_vm8, %v5732_v12  ;;  %v5712_v63 = vsel %vm5711_vm4, %v5707_v62, %v5628_v58 }
 0x57b   : > { %v5632_v21 = vpop.permute.xlu0 %5631 }
 0x57c   : > { %v5714_v33 = vsel %vm5711_vm4, %v5709_v40, %v5632_v21 }
 0x57f   : > { %v5644_v59 = vpop.permute.xlu0 %5643 }
 0x580   : > { %v5716_v35 = vsel %vm151_vm0, %v5712_v63, %v5644_v59 }
 0x583   : > { %v5648_v9 = vpop.permute.xlu0 %5647 }
 0x584   : > { %v5718_v32 = vsel %vm151_vm0, %v5714_v33, %v5648_v9 }
 0x587   : > { %v5660_v6 = vpop.permute.xlu0 %5659 }
 0x588   : > { %v5721_v24 = vsel %vm5720_vm5, %v5716_v35, %v5660_v6 }
 0x58b   : > { %v5664_v7 = vpop.permute.xlu0 %5663 }
 0x58c   : > { %v5723_v60 = vsel %vm5720_vm5, %v5718_v32, %v5664_v7 }
 0x58f   : > { %v5676_v28 = vpop.permute.xlu0 %5675 }
 0x590   : > { %v5726_v4 = vsel %vm5725_vm6, %v5721_v24, %v5676_v28 }
 0x597   : > { %v5680_v5 = vpop.permute.xlu0 %5679 }
 0x598   : > { %v5728_v16 = vsel %vm5725_vm6, %v5723_v60, %v5680_v5 }
 0x5a9   : > { %v5698_v18 = vpop.permute.xlu1 %5697 }
 0x5aa   : > { %v5734_v19 = vsel %vm5730_vm7, %v5729_v51, %v5698_v18 }
 0x5ab   : > { %5739 = vst.msk [vmem:[%s7843_s29 + $0x18] sm:$0xff] %vm5735_vm8, %v5734_v19 }
 0x5ad   : > { %v5692_v0 = vpop.permute.xlu0 %5691 }
 0x5ae   : > { %v5731_v20 = vsel %vm5730_vm7, %v5726_v4, %v5692_v0 }
 0x5af   : > { %5736 = vst.msk [vmem:[%s7843_s29] sm:$0xff] %vm5735_vm8, %v5731_v20 }
 0x5b1   : > { %v5696_v42 = vpop.permute.xlu0 %5695 }
 0x5b2   : > { %v5733_v38 = vsel %vm5730_vm7, %v5728_v16, %v5696_v42 }
 0x5b3   : > { %5738 = vst.msk [vmem:[%s7843_s29 + $0x10] sm:$0xff] %vm5735_vm8, %v5733_v38 }
 0x5b4   : > { %6596 = shalt.err (!%p6593_p3)
}
 0x5b5   : > { %s6597_s17 = scalar_lea.hbm %s7876_s6, 512  ;;  %s6601_s24 = scalar_lea.hbm %s7927_s2, 1024 }
 0x5b6   : > { %p6598_p4 = scmp.ne.s32.totalorder %s7876_s6, %s6597_s17  ;;  %p6602_p9 = scmp.lt.u32.totalorder %s7876_s6, %s7927_s2 }
 0x5b7   : > { %p6603_p10 = scmp.lt.u32.totalorder %s6601_s24, %s6597_s17  ;;  %p6605_p12 = scmp.lt.u32.totalorder %s6597_s17, %s7876_s6 }
 0x5b8   : > { %p6599_p7 = pnand %p6598_p4, %p6720_p5 }
 0x5b9   : > { %p6604_p11 = por %p6603_p10, %p6602_p9 }
 0x5ba   : > { %p6600_p8 = pneg %p6599_p7 }
 0x5bb   : > { %p6606_p13 = por %p6605_p12, %p6604_p11 }
 0x5bd   : > { %p6607_p0 = pnand %p6606_p13, %p6600_p8 }
 0x5bf   : > { %6610 = shalt.err (!%p6607_p0)
}
 0x5c0   : > { %s6666_s27 = smov 128  }
 0x5c1   : > { %6397 = dma.vmem_to_hbm [thread:$0]  (%p6720_p5), %s7869_s30, 512, %s7876_s6, %s7883_s13, %s6666_s27, %s6666_s27, %s6659_s21  }
 0x5c2 PF: > { %p6403_p1 = scmp.ge.s32.totalorder %s6645_s12, 2  ;;  %s5769_s28 = sand.u32 1, %s6633_s9  }
 0x5c3   : > { %s5770_s29 = scalar_lea.sflag [#allocation3], %s5769_s28 }
 0x5c4   : > { %p6400_p2 = pnand %p6403_p1, %p6724_p6 }
 0x5c6   : > { %6628 = dma.done.wait (!%p6400_p2), %s5770_s29, 512  }
 0x5c7   : > { %6630 = vsyncadd (!%p6400_p2), %s5770_s29, 4294966784  ;;  %p12_p3 = scmp.ge.s32.totalorder %s6707_s15, 4   ;;  %s7953_s9 = smov %s6637_s10 }
 0x5c8   : > { %s7954_s10 = smov %s6641_s11  ;;  %s7955_s11 = smov %s6718_s18 }
 0x5c9   : > { %s7956_s12 = smov %s6707_s15  ;;  %14 = sbr.rel (!%p12_p3) target bundleno = 3 (0x3), region = 63 }
 0x5d0   :  { %5775 = vsyncpa [#allocation3], 1 }
 0x5d1   :  { %5777 = vsyncpa [#allocation3 + $0x1], 1 }

</bundles_post_ra>
